<compile_context>
chip_gen: v5e
topology: v5e:2x2
jax: 0.10.0
libtpu: 0.0.40
codegen_flags: <defaults>
</compile_context>

<pallas_src>
import math
import numpy as np
import jax
import jax.numpy as jnp
from jax.experimental import pallas as pl
from jax.experimental.pallas import tpu as pltpu

# ----- static model config (matches TransformerCLF defaults) -----
NTOK = 4
D_MODEL = 4
NHEAD = 1
D_FFN = 8
NOUT = 1
LN_EPS = 1e-6

# ----- example shapes -----
SEQ = 8
BATCH = 2

# ----- row layout of the packed bias / LayerNorm slab ("vecs") -----
_BQ, _BK, _BV, _BO = 0, 1, 2, 3
_LN1A, _LN1B, _LN2A, _LN2B, _LNFA, _LNFB = 4, 5, 6, 7, 8, 9
_B1, _B2 = 10, 11
_NVEC = 12
_VEC_W = D_FFN  # widest packed vector (b1 is D_FFN wide)


def _layernorm(x, a, b, eps=LN_EPS):
    # annotated-transformer LayerNorm: a*(x-mean)/(std+eps)+b with unbiased std (N-1)
    mean = jnp.mean(x, axis=-1, keepdims=True)
    d = x.shape[-1]
    var = jnp.sum((x - mean) ** 2, axis=-1, keepdims=True) / (d - 1)
    return a * (x - mean) / (jnp.sqrt(var) + eps) + b


def transformer_clf_kernel(
    tok_ref,     # (B_TILE, S) int32 tokens
    len_ref,     # (B_TILE, 1) int32 lengths
    embpe_ref,   # (NTOK + S, D)   rows [0:NTOK]=embedding, [NTOK:]=positional encoding
    wqkvo_ref,   # (D, 4*D)        [wq | wk | wv | wo]
    wffn_ref,    # (D + D_FFN + D, D_FFN)  rows: w1 | w2(pad) | wdec(pad)
    vecs_ref,    # (_NVEC, _VEC_W) packed biases + LN scales/shifts
    out_ref,     # (B_TILE, NOUT)
):
    BT, S = tok_ref.shape
    M = BT * S
    D = D_MODEL
    f32 = jnp.float32

    emb = embpe_ref[0:NTOK, :]                  # (NTOK, D)
    pe = embpe_ref[NTOK:NTOK + S, :]            # (S, D)

    def vec(i, w=D):
        return vecs_ref[i:i + 1, 0:w]           # (1, w)

    bq, bk, bv, bo = vec(_BQ), vec(_BK), vec(_BV), vec(_BO)
    ln1a, ln1b = vec(_LN1A), vec(_LN1B)
    ln2a, ln2b = vec(_LN2A), vec(_LN2B)
    lnfa, lnfb = vec(_LNFA), vec(_LNFB)
    b1 = vec(_B1, D_FFN)
    b2 = vec(_B2)

    w1 = wffn_ref[0:D, :]                                   # (D, D_FFN)
    w2 = wffn_ref[D:D + D_FFN, 0:D]                         # (D_FFN, D)
    wdec = wffn_ref[D + D_FFN:D + D_FFN + D, 0:NOUT]        # (D, NOUT)
    wqkv = wqkvo_ref[:, 0:3 * D]                            # (D, 3D)
    wo = wqkvo_ref[:, 3 * D:4 * D]                          # (D, D)

    # ---- embedding via in-kernel one-hot matmul, scaled by sqrt(d_model), + absolute PE ----
    tok = tok_ref[...]                                      # (BT, S) int32
    oh3 = (jax.lax.broadcasted_iota(jnp.int32, (BT, S, NTOK), 2)
           == tok[:, :, None]).astype(f32)                  # (BT, S, NTOK)
    oh = oh3.reshape(M, NTOK)                               # flat, minor dim unchanged
    x = jnp.dot(oh, emb, preferred_element_type=f32) * math.sqrt(D)     # (M, D)
    x = x + jnp.tile(pe, (BT, 1))                           # PE repeated per sequence

    # ---- sublayer 1: pre-LN multi-head self-attention + residual ----
    xn = _layernorm(x, ln1a, ln1b)
    qkv = jnp.dot(xn, wqkv, preferred_element_type=f32)     # one fused (M,D)x(D,3D) matmul
    q = (qkv[:, 0:D] + bq).reshape(BT, S, D)
    k = (qkv[:, D:2 * D] + bk).reshape(BT, S, D)
    v = (qkv[:, 2 * D:3 * D] + bv).reshape(BT, S, D)

    dk = D // NHEAD
    heads = []
    for h in range(NHEAD):                                  # static loop (NHEAD=1 default)
        qh = q[:, :, h * dk:(h + 1) * dk]
        kh = k[:, :, h * dk:(h + 1) * dk]
        vh = v[:, :, h * dk:(h + 1) * dk]
        scores = jnp.einsum('bqd,bkd->bqk', qh, kh,
                            preferred_element_type=f32) * (1.0 / math.sqrt(dk))
        smax = jnp.max(scores, axis=-1, keepdims=True)
        sexp = jnp.exp(scores - smax)
        probs = sexp * pl.reciprocal(jnp.sum(sexp, axis=-1, keepdims=True))
        heads.append(jnp.einsum('bqk,bkd->bqd', probs, vh,
                                preferred_element_type=f32))
    attn3 = heads[0] if NHEAD == 1 else jnp.concatenate(heads, axis=-1)   # (BT, S, D)
    attn = attn3.reshape(M, D)
    x = x + jnp.dot(attn, wo, preferred_element_type=f32) + bo

    # ---- sublayer 2: pre-LN feed-forward (Linear -> ReLU -> Linear) + residual ----
    xn2 = _layernorm(x, ln2a, ln2b)
    h1 = jnp.maximum(jnp.dot(xn2, w1, preferred_element_type=f32) + b1, 0.0)
    x = x + jnp.dot(h1, w2, preferred_element_type=f32) + b2

    # ---- per-sequence selection of row lengths[b]-1, then final LN + decode + sigmoid ----
    # (row is picked BEFORE the encoder-final LayerNorm; LN is per-row so it's equivalent
    #  to normalizing the whole block and then selecting, but far cheaper.)
    idx = jnp.maximum(len_ref[...] - 1, 0)                             # (BT, 1), clamp >=0
    sel = (jax.lax.broadcasted_iota(jnp.int32, (BT, S), 1)
           == idx).astype(f32)                                         # (BT, S) one-hot
    x3 = x.reshape(BT, S, D)
    rows = jnp.sum(sel[:, :, None] * x3, axis=1)                       # (BT, D) gather
    rows = _layernorm(rows, lnfa, lnfb)                                # final encoder LN
    dec = jnp.dot(rows, wdec, preferred_element_type=f32)              # (BT, NOUT)
    out_ref[...] = jax.nn.sigmoid(dec)


def transformer_clf_forward(tokens_sb, lengths, params, b_tile=None):
    """tokens_sb: (S, B) int32, lengths: (B,) int32 -> (B, NOUT) float32."""
    S, B = tokens_sb.shape
    if b_tile is None:
        b_tile = min(128, -(-B // 8) * 8)      # >=8 sublanes, <=128, multiple of 8
    n_blk = -(-B // b_tile)
    b_pad = n_blk * b_tile

    tokens_bs = jnp.pad(tokens_sb.T.astype(jnp.int32), ((0, b_pad - B), (0, 0)))
    lengths2d = jnp.pad(lengths.astype(jnp.int32), (0, b_pad - B),
                        constant_values=1).reshape(b_pad, 1)

    # ---- pack parameters into a handful of slabs (few DMAs / BlockSpecs) ----
    embpe = jnp.concatenate([params["emb"], params["pe"][:S]], axis=0)        # (NTOK+S, D)
    wqkvo = jnp.concatenate(
        [params["wq"], params["wk"], params["wv"], params["wo"]], axis=1)     # (D, 4D)
    w2p = jnp.pad(params["w2"], ((0, 0), (0, _VEC_W - D_MODEL)))
    wdp = jnp.pad(params["wdec"], ((0, 0), (0, _VEC_W - NOUT)))
    wffn = jnp.concatenate([params["w1"], w2p, wdp], axis=0)                  # (D+D_FFN+D, 8)

    def row(v):
        v = v.reshape(1, -1)
        return jnp.pad(v, ((0, 0), (0, _VEC_W - v.shape[1])))
    vecs = jnp.concatenate([
        row(params["bq"]), row(params["bk"]), row(params["bv"]), row(params["bo"]),
        row(params["ln1a"]), row(params["ln1b"]), row(params["ln2a"]), row(params["ln2b"]),
        row(params["lnfa"]), row(params["lnfb"]), row(params["b1"]), row(params["b2"]),
    ], axis=0)                                                                # (_NVEC, 8)

    def full_spec(arr):
        nd = arr.ndim
        return pl.BlockSpec(arr.shape, lambda b, nd=nd: (0,) * nd)

    f = pl.pallas_call(
        transformer_clf_kernel,
        out_shape=jax.ShapeDtypeStruct((b_pad, NOUT), jnp.float32),
        grid_spec=pltpu.PrefetchScalarGridSpec(
            num_scalar_prefetch=0,
            grid=(n_blk,),
            in_specs=[
                pl.BlockSpec((b_tile, S), lambda b: (b, 0)),      # tokens block
                pl.BlockSpec((b_tile, 1), lambda b: (b, 0)),      # lengths block
                full_spec(embpe), full_spec(wqkvo),
                full_spec(wffn), full_spec(vecs),
            ],
            out_specs=pl.BlockSpec((b_tile, NOUT), lambda b: (b, 0)),
        ),
        compiler_params=pltpu.CompilerParams(
            dimension_semantics=("parallel",)),   # disjoint output blocks -> shard across TCs
    )
    out_pad = f(tokens_bs, lengths2d, embpe, wqkvo, wffn, vecs)
    return out_pad[:B]


# ----- deterministic parameter construction (synthetic; no checkpoint load) -----
def sinusoidal_pe(max_len, d_model):
    position = np.arange(max_len, dtype=np.float32)[:, None]
    div_term = np.exp(np.arange(0, d_model, 2, dtype=np.float32)
                      * -(math.log(10000.0) / d_model))
    pe = np.zeros((max_len, d_model), dtype=np.float32)
    pe[:, 0::2] = np.sin(position * div_term)
    pe[:, 1::2] = np.cos(position * div_term)
    return jnp.asarray(pe)


def init_params(key):
    keys = jax.random.split(key, 8)

    def uni(k, shape, bound):
        return jax.random.uniform(k, shape, jnp.float32, -bound, bound)

    d, lb = D_MODEL, 1.0 / math.sqrt(D_MODEL)
    p = {
        "emb": jax.random.normal(keys[0], (NTOK, d), jnp.float32),
        "pe": sinusoidal_pe(1000, d),
        "wq": uni(keys[1], (d, d), lb), "bq": jnp.zeros((1, d), jnp.float32),
        "wk": uni(keys[2], (d, d), lb), "bk": jnp.zeros((1, d), jnp.float32),
        "wv": uni(keys[3], (d, d), lb), "bv": jnp.zeros((1, d), jnp.float32),
        "wo": uni(keys[4], (d, d), lb), "bo": jnp.zeros((1, d), jnp.float32),
        "ln1a": jnp.ones((1, d), jnp.float32), "ln1b": jnp.zeros((1, d), jnp.float32),
        "ln2a": jnp.ones((1, d), jnp.float32), "ln2b": jnp.zeros((1, d), jnp.float32),
        "lnfa": jnp.ones((1, d), jnp.float32), "lnfb": jnp.zeros((1, d), jnp.float32),
        "w1": uni(keys[5], (d, D_FFN), lb), "b1": jnp.zeros((1, D_FFN), jnp.float32),
        "w2": uni(keys[6], (D_FFN, d), 1.0 / math.sqrt(D_FFN)),
        "b2": jnp.zeros((1, d), jnp.float32),
        "wdec": uni(keys[7], (d, NOUT), lb),
    }
    return p


# ----- pure-JAX reference (mirrors the PyTorch forward, nhead=1, nlayers=1) -----
def reference_forward(tokens_sb, lengths, p):
    S, B = tokens_sb.shape
    emb = p["emb"][tokens_sb] * math.sqrt(D_MODEL)           # (S, B, D)
    emb = emb + p["pe"][:S][:, None, :]
    x = jnp.transpose(emb, (1, 0, 2))                        # (B, S, D)

    def ln(z, a, b):
        mean = jnp.mean(z, -1, keepdims=True)
        var = jnp.sum((z - mean) ** 2, -1, keepdims=True) / (z.shape[-1] - 1)
        return a * (z - mean) / (jnp.sqrt(var) + LN_EPS) + b

    xn = ln(x, p["ln1a"], p["ln1b"])
    q = xn @ p["wq"] + p["bq"]
    k = xn @ p["wk"] + p["bk"]
    v = xn @ p["wv"] + p["bv"]
    scores = jnp.einsum("bqd,bkd->bqk", q, k) / math.sqrt(D_MODEL // NHEAD)
    attn = jax.nn.softmax(scores, -1) @ v
    x = x + (attn @ p["wo"] + p["bo"])
    xn2 = ln(x, p["ln2a"], p["ln2b"])
    x = x + (jax.nn.relu(xn2 @ p["w1"] + p["b1"]) @ p["w2"] + p["b2"])
    xf = ln(x, p["lnfa"], p["lnfb"])
    rows = xf[jnp.arange(B), lengths - 1]                    # (B, D)
    return jax.nn.sigmoid(rows @ p["wdec"])


if __name__ == "__main__":
    key = jax.random.PRNGKey(0)
    kp, kt, kl = jax.random.split(key, 3)
    params = init_params(kp)

    tokens = jax.random.randint(kt, (SEQ, BATCH), 0, NTOK, dtype=jnp.int32)   # (seq, batch)
    lengths = jax.random.randint(kl, (BATCH,), 1, SEQ + 1, dtype=jnp.int32)   # (batch,)

    out = transformer_clf_forward(tokens, lengths, params)
    out = jax.block_until_ready(out)

    ref = reference_forward(tokens, lengths, params)
    assert out.shape == (BATCH, NOUT)
    np.testing.assert_allclose(np.asarray(out), np.asarray(ref), rtol=1e-4, atol=1e-5)
    print("KERNEL_OK")
</pallas_src>

<mosaic_0001>
module attributes {stable_mosaic.version = 11 : i64} {
  func.func @transformer_clf_kernel(%arg0: i32, %arg1: memref<8x8xi32, #tpu.memory_space<vmem>>, %arg2: memref<8x1xi32, #tpu.memory_space<vmem>>, %arg3: memref<12x4xf32, #tpu.memory_space<vmem>>, %arg4: memref<4x16xf32, #tpu.memory_space<vmem>>, %arg5: memref<16x8xf32, #tpu.memory_space<vmem>>, %arg6: memref<12x8xf32, #tpu.memory_space<vmem>>, %arg7: memref<8x1xf32, #tpu.memory_space<vmem>>) attributes {dimension_semantics = [#tpu.dimension_semantics<parallel>], iteration_bounds = array<i64: 1>, scalar_prefetch = 0 : i64, scratch_operands = 0 : i64, tpu.core_type = #tpu.core_type<tc>, window_params = [{transform_indices = @transform_0, window_bounds = array<i64: 8, 8>}, {transform_indices = @transform_1, window_bounds = array<i64: 8, 1>}, {pipeline_mode = #tpu.pipeline_mode<synchronous>, transform_indices = @transform_2, window_bounds = array<i64: 12, 4>}, {pipeline_mode = #tpu.pipeline_mode<synchronous>, transform_indices = @transform_3, window_bounds = array<i64: 4, 16>}, {pipeline_mode = #tpu.pipeline_mode<synchronous>, transform_indices = @transform_4, window_bounds = array<i64: 16, 8>}, {pipeline_mode = #tpu.pipeline_mode<synchronous>, transform_indices = @transform_5, window_bounds = array<i64: 12, 8>}, {transform_indices = @transform_6, window_bounds = array<i64: 8, 1>}]} {
    %c0 = arith.constant 0 : index
    %c0_0 = arith.constant 0 : index
    %0 = vector.load %arg3[%c0, %c0_0] : memref<12x4xf32, #tpu.memory_space<vmem>>, vector<4x4xf32>
    %c4 = arith.constant 4 : index
    %c0_1 = arith.constant 0 : index
    %1 = vector.load %arg3[%c4, %c0_1] : memref<12x4xf32, #tpu.memory_space<vmem>>, vector<8x4xf32>
    %c0_2 = arith.constant 0 : index
    %c0_3 = arith.constant 0 : index
    %2 = vector.load %arg6[%c0_2, %c0_3] : memref<12x8xf32, #tpu.memory_space<vmem>>, vector<1x4xf32>
    %c1 = arith.constant 1 : index
    %c0_4 = arith.constant 0 : index
    %3 = vector.load %arg6[%c1, %c0_4] : memref<12x8xf32, #tpu.memory_space<vmem>>, vector<1x4xf32>
    %c2 = arith.constant 2 : index
    %c0_5 = arith.constant 0 : index
    %4 = vector.load %arg6[%c2, %c0_5] : memref<12x8xf32, #tpu.memory_space<vmem>>, vector<1x4xf32>
    %c3 = arith.constant 3 : index
    %c0_6 = arith.constant 0 : index
    %5 = vector.load %arg6[%c3, %c0_6] : memref<12x8xf32, #tpu.memory_space<vmem>>, vector<1x4xf32>
    %c4_7 = arith.constant 4 : index
    %c0_8 = arith.constant 0 : index
    %6 = vector.load %arg6[%c4_7, %c0_8] : memref<12x8xf32, #tpu.memory_space<vmem>>, vector<1x4xf32>
    %c5 = arith.constant 5 : index
    %c0_9 = arith.constant 0 : index
    %7 = vector.load %arg6[%c5, %c0_9] : memref<12x8xf32, #tpu.memory_space<vmem>>, vector<1x4xf32>
    %c6 = arith.constant 6 : index
    %c0_10 = arith.constant 0 : index
    %8 = vector.load %arg6[%c6, %c0_10] : memref<12x8xf32, #tpu.memory_space<vmem>>, vector<1x4xf32>
    %c7 = arith.constant 7 : index
    %c0_11 = arith.constant 0 : index
    %9 = vector.load %arg6[%c7, %c0_11] : memref<12x8xf32, #tpu.memory_space<vmem>>, vector<1x4xf32>
    %c8 = arith.constant 8 : index
    %c0_12 = arith.constant 0 : index
    %10 = vector.load %arg6[%c8, %c0_12] : memref<12x8xf32, #tpu.memory_space<vmem>>, vector<1x4xf32>
    %c9 = arith.constant 9 : index
    %c0_13 = arith.constant 0 : index
    %11 = vector.load %arg6[%c9, %c0_13] : memref<12x8xf32, #tpu.memory_space<vmem>>, vector<1x4xf32>
    %c10 = arith.constant 10 : index
    %c0_14 = arith.constant 0 : index
    %12 = vector.load %arg6[%c10, %c0_14] : memref<12x8xf32, #tpu.memory_space<vmem>>, vector<1x8xf32>
    %c11 = arith.constant 11 : index
    %c0_15 = arith.constant 0 : index
    %13 = vector.load %arg6[%c11, %c0_15] : memref<12x8xf32, #tpu.memory_space<vmem>>, vector<1x4xf32>
    %c0_16 = arith.constant 0 : index
    %c0_17 = arith.constant 0 : index
    %14 = vector.load %arg5[%c0_16, %c0_17] : memref<16x8xf32, #tpu.memory_space<vmem>>, vector<4x8xf32>
    %c4_18 = arith.constant 4 : index
    %c0_19 = arith.constant 0 : index
    %15 = vector.load %arg5[%c4_18, %c0_19] : memref<16x8xf32, #tpu.memory_space<vmem>>, vector<8x4xf32>
    %c12 = arith.constant 12 : index
    %c0_20 = arith.constant 0 : index
    %16 = vector.load %arg5[%c12, %c0_20] : memref<16x8xf32, #tpu.memory_space<vmem>>, vector<4x1xf32>
    %c0_21 = arith.constant 0 : index
    %c0_22 = arith.constant 0 : index
    %17 = vector.load %arg4[%c0_21, %c0_22] : memref<4x16xf32, #tpu.memory_space<vmem>>, vector<4x12xf32>
    %c0_23 = arith.constant 0 : index
    %c12_24 = arith.constant 12 : index
    %18 = vector.load %arg4[%c0_23, %c12_24] : memref<4x16xf32, #tpu.memory_space<vmem>>, vector<4x4xf32>
    %c0_25 = arith.constant 0 : index
    %c0_26 = arith.constant 0 : index
    %19 = vector.load %arg1[%c0_25, %c0_26] : memref<8x8xi32, #tpu.memory_space<vmem>>, vector<8x8xi32>
    %20 = tpu.iota {dimensions = array<i32: 2>} : vector<8x8x4xi32>
    %21 = vector.shape_cast %19 : vector<8x8xi32> to vector<8x8x1xi32>
    %22 = vector.broadcast %21 : vector<8x8x1xi32> to vector<8x8x4xi32>
    %23 = arith.cmpi eq, %20, %22 : vector<8x8x4xi32>
    %24 = arith.extui %23 : vector<8x8x4xi1> to vector<8x8x4xi32>
    %25 = arith.sitofp %24 : vector<8x8x4xi32> to vector<8x8x4xf32>
    %26 = vector.shape_cast %25 : vector<8x8x4xf32> to vector<64x4xf32>
    %cst = arith.constant dense<0.000000e+00> : vector<64x4xf32>
    %27 = tpu.matmul %26, %0, %cst {dimension_numbers = #tpu.dot_dimension_numbers<[1], [0], [0], [1], [0, 0, 1, 1], [], []>} : vector<64x4xf32>, vector<4x4xf32>, vector<64x4xf32> -> vector<64x4xf32>
    %cst_27 = arith.constant 2.000000e+00 : f32
    %28 = vector.broadcast %cst_27 : f32 to vector<64x4xf32>
    %29 = arith.mulf %27, %28 : vector<64x4xf32>
    %30 = tpu.concatenate %1, %1, %1, %1, %1, %1, %1, %1 in 0 : vector<8x4xf32>, vector<8x4xf32>, vector<8x4xf32>, vector<8x4xf32>, vector<8x4xf32>, vector<8x4xf32>, vector<8x4xf32>, vector<8x4xf32> -> vector<64x4xf32>
    %31 = arith.addf %29, %30 : vector<64x4xf32>
    %cst_28 = arith.constant dense<0.000000e+00> : vector<64xf32>
    %32 = vector.multi_reduction <add>, %31, %cst_28 [1] : vector<64x4xf32> to vector<64xf32>
    %33 = vector.shape_cast %32 : vector<64xf32> to vector<64x1xf32>
    %cst_29 = arith.constant 4.000000e+00 : f32
    %34 = vector.broadcast %cst_29 : f32 to vector<64x1xf32>
    %35 = arith.divf %33, %34 : vector<64x1xf32>
    %36 = vector.broadcast %35 : vector<64x1xf32> to vector<64x4xf32>
    %37 = arith.subf %31, %36 : vector<64x4xf32>
    %38 = arith.mulf %37, %37 : vector<64x4xf32>
    %cst_30 = arith.constant dense<0.000000e+00> : vector<64xf32>
    %39 = vector.multi_reduction <add>, %38, %cst_30 [1] : vector<64x4xf32> to vector<64xf32>
    %40 = vector.shape_cast %39 : vector<64xf32> to vector<64x1xf32>
    %cst_31 = arith.constant 3.000000e+00 : f32
    %41 = vector.broadcast %cst_31 : f32 to vector<64x1xf32>
    %42 = arith.divf %40, %41 : vector<64x1xf32>
    %43 = vector.broadcast %35 : vector<64x1xf32> to vector<64x4xf32>
    %44 = arith.subf %31, %43 : vector<64x4xf32>
    %45 = vector.broadcast %6 : vector<1x4xf32> to vector<64x4xf32>
    %46 = arith.mulf %45, %44 : vector<64x4xf32>
    %47 = math.sqrt %42 : vector<64x1xf32>
    %cst_32 = arith.constant 9.99999997E-7 : f32
    %48 = vector.broadcast %cst_32 : f32 to vector<64x1xf32>
    %49 = arith.addf %47, %48 : vector<64x1xf32>
    %50 = vector.broadcast %49 : vector<64x1xf32> to vector<64x4xf32>
    %51 = arith.divf %46, %50 : vector<64x4xf32>
    %52 = vector.broadcast %7 : vector<1x4xf32> to vector<64x4xf32>
    %53 = arith.addf %51, %52 : vector<64x4xf32>
    %cst_33 = arith.constant dense<0.000000e+00> : vector<64x12xf32>
    %54 = tpu.matmul %53, %17, %cst_33 {dimension_numbers = #tpu.dot_dimension_numbers<[1], [0], [0], [1], [0, 0, 1, 1], [], []>} : vector<64x4xf32>, vector<4x12xf32>, vector<64x12xf32> -> vector<64x12xf32>
    %55 = vector.extract_strided_slice %54 {offsets = [0, 0], sizes = [64, 4], strides = [1, 1]} : vector<64x12xf32> to vector<64x4xf32>
    %56 = vector.broadcast %2 : vector<1x4xf32> to vector<64x4xf32>
    %57 = arith.addf %55, %56 : vector<64x4xf32>
    %58 = vector.shape_cast %57 : vector<64x4xf32> to vector<8x8x4xf32>
    %59 = vector.extract_strided_slice %54 {offsets = [0, 4], sizes = [64, 4], strides = [1, 1]} : vector<64x12xf32> to vector<64x4xf32>
    %60 = vector.broadcast %3 : vector<1x4xf32> to vector<64x4xf32>
    %61 = arith.addf %59, %60 : vector<64x4xf32>
    %62 = vector.shape_cast %61 : vector<64x4xf32> to vector<8x8x4xf32>
    %63 = vector.extract_strided_slice %54 {offsets = [0, 8], sizes = [64, 4], strides = [1, 1]} : vector<64x12xf32> to vector<64x4xf32>
    %64 = vector.broadcast %4 : vector<1x4xf32> to vector<64x4xf32>
    %65 = arith.addf %63, %64 : vector<64x4xf32>
    %66 = vector.shape_cast %65 : vector<64x4xf32> to vector<8x8x4xf32>
    "tpu.trace_start"() <{level = 10 : i32, message = "bqd,bkd->bqk"}> : () -> ()
    %cst_34 = arith.constant dense<0.000000e+00> : vector<8x8x8xf32>
    %67 = tpu.matmul %58, %62, %cst_34 {dimension_numbers = #tpu.dot_dimension_numbers<[2], [2], [1], [1], [0, 0, 0, 1, 1, 1], [0], [0]>} : vector<8x8x4xf32>, vector<8x8x4xf32>, vector<8x8x8xf32> -> vector<8x8x8xf32>
    "tpu.trace_stop"() : () -> ()
    %cst_35 = arith.constant 5.000000e-01 : f32
    %68 = vector.broadcast %cst_35 : f32 to vector<8x8x8xf32>
    %69 = arith.mulf %67, %68 : vector<8x8x8xf32>
    %cst_36 = arith.constant dense<0xFF800000> : vector<8x8xf32>
    %70 = vector.multi_reduction <maximumf>, %69, %cst_36 [2] : vector<8x8x8xf32> to vector<8x8xf32>
    %71 = vector.shape_cast %70 : vector<8x8xf32> to vector<8x8x1xf32>
    %72 = vector.broadcast %71 : vector<8x8x1xf32> to vector<8x8x8xf32>
    %73 = arith.subf %69, %72 : vector<8x8x8xf32>
    %74 = math.exp %73 : vector<8x8x8xf32>
    %cst_37 = arith.constant dense<0.000000e+00> : vector<8x8xf32>
    %75 = vector.multi_reduction <add>, %74, %cst_37 [2] : vector<8x8x8xf32> to vector<8x8xf32>
    %76 = vector.shape_cast %75 : vector<8x8xf32> to vector<8x8x1xf32>
    %77 = tpu.reciprocal %76 : vector<8x8x1xf32> -> vector<8x8x1xf32>
    %78 = vector.broadcast %77 : vector<8x8x1xf32> to vector<8x8x8xf32>
    %79 = arith.mulf %74, %78 : vector<8x8x8xf32>
    "tpu.trace_start"() <{level = 10 : i32, message = "bqk,bkd->bqd"}> : () -> ()
    %cst_38 = arith.constant dense<0.000000e+00> : vector<8x8x4xf32>
    %80 = tpu.matmul %79, %66, %cst_38 {dimension_numbers = #tpu.dot_dimension_numbers<[2], [1], [1], [2], [0, 0, 0, 1, 1, 2], [0], [0]>} : vector<8x8x8xf32>, vector<8x8x4xf32>, vector<8x8x4xf32> -> vector<8x8x4xf32>
    "tpu.trace_stop"() : () -> ()
    %81 = vector.shape_cast %80 : vector<8x8x4xf32> to vector<64x4xf32>
    %cst_39 = arith.constant dense<0.000000e+00> : vector<64x4xf32>
    %82 = tpu.matmul %81, %18, %cst_39 {dimension_numbers = #tpu.dot_dimension_numbers<[1], [0], [0], [1], [0, 0, 1, 1], [], []>} : vector<64x4xf32>, vector<4x4xf32>, vector<64x4xf32> -> vector<64x4xf32>
    %83 = arith.addf %31, %82 : vector<64x4xf32>
    %84 = vector.broadcast %5 : vector<1x4xf32> to vector<64x4xf32>
    %85 = arith.addf %83, %84 : vector<64x4xf32>
    %cst_40 = arith.constant dense<0.000000e+00> : vector<64xf32>
    %86 = vector.multi_reduction <add>, %85, %cst_40 [1] : vector<64x4xf32> to vector<64xf32>
    %87 = vector.shape_cast %86 : vector<64xf32> to vector<64x1xf32>
    %cst_41 = arith.constant 4.000000e+00 : f32
    %88 = vector.broadcast %cst_41 : f32 to vector<64x1xf32>
    %89 = arith.divf %87, %88 : vector<64x1xf32>
    %90 = vector.broadcast %89 : vector<64x1xf32> to vector<64x4xf32>
    %91 = arith.subf %85, %90 : vector<64x4xf32>
    %92 = arith.mulf %91, %91 : vector<64x4xf32>
    %cst_42 = arith.constant dense<0.000000e+00> : vector<64xf32>
    %93 = vector.multi_reduction <add>, %92, %cst_42 [1] : vector<64x4xf32> to vector<64xf32>
    %94 = vector.shape_cast %93 : vector<64xf32> to vector<64x1xf32>
    %cst_43 = arith.constant 3.000000e+00 : f32
    %95 = vector.broadcast %cst_43 : f32 to vector<64x1xf32>
    %96 = arith.divf %94, %95 : vector<64x1xf32>
    %97 = vector.broadcast %89 : vector<64x1xf32> to vector<64x4xf32>
    %98 = arith.subf %85, %97 : vector<64x4xf32>
    %99 = vector.broadcast %8 : vector<1x4xf32> to vector<64x4xf32>
    %100 = arith.mulf %99, %98 : vector<64x4xf32>
    %101 = math.sqrt %96 : vector<64x1xf32>
    %cst_44 = arith.constant 9.99999997E-7 : f32
    %102 = vector.broadcast %cst_44 : f32 to vector<64x1xf32>
    %103 = arith.addf %101, %102 : vector<64x1xf32>
    %104 = vector.broadcast %103 : vector<64x1xf32> to vector<64x4xf32>
    %105 = arith.divf %100, %104 : vector<64x4xf32>
    %106 = vector.broadcast %9 : vector<1x4xf32> to vector<64x4xf32>
    %107 = arith.addf %105, %106 : vector<64x4xf32>
    %cst_45 = arith.constant dense<0.000000e+00> : vector<64x8xf32>
    %108 = tpu.matmul %107, %14, %cst_45 {dimension_numbers = #tpu.dot_dimension_numbers<[1], [0], [0], [1], [0, 0, 1, 1], [], []>} : vector<64x4xf32>, vector<4x8xf32>, vector<64x8xf32> -> vector<64x8xf32>
    %109 = vector.broadcast %12 : vector<1x8xf32> to vector<64x8xf32>
    %110 = arith.addf %108, %109 : vector<64x8xf32>
    %cst_46 = arith.constant 0.000000e+00 : f32
    %111 = vector.broadcast %cst_46 : f32 to vector<64x8xf32>
    %112 = arith.maximumf %110, %111 : vector<64x8xf32>
    %cst_47 = arith.constant dense<0.000000e+00> : vector<64x4xf32>
    %113 = tpu.matmul %112, %15, %cst_47 {dimension_numbers = #tpu.dot_dimension_numbers<[1], [0], [0], [1], [0, 0, 1, 1], [], []>} : vector<64x8xf32>, vector<8x4xf32>, vector<64x4xf32> -> vector<64x4xf32>
    %114 = arith.addf %85, %113 : vector<64x4xf32>
    %115 = vector.broadcast %13 : vector<1x4xf32> to vector<64x4xf32>
    %116 = arith.addf %114, %115 : vector<64x4xf32>
    %c0_48 = arith.constant 0 : index
    %c0_49 = arith.constant 0 : index
    %117 = vector.load %arg2[%c0_48, %c0_49] : memref<8x1xi32, #tpu.memory_space<vmem>>, vector<8x1xi32>
    %c1_i32 = arith.constant 1 : i32
    %118 = vector.broadcast %c1_i32 : i32 to vector<8x1xi32>
    %119 = arith.subi %117, %118 : vector<8x1xi32>
    %c0_i32 = arith.constant 0 : i32
    %120 = vector.broadcast %c0_i32 : i32 to vector<8x1xi32>
    %121 = arith.maxsi %119, %120 : vector<8x1xi32>
    %122 = tpu.iota {dimensions = array<i32: 1>} : vector<8x8xi32>
    %123 = vector.broadcast %121 : vector<8x1xi32> to vector<8x8xi32>
    %124 = arith.cmpi eq, %122, %123 : vector<8x8xi32>
    %125 = arith.extui %124 : vector<8x8xi1> to vector<8x8xi32>
    %126 = arith.sitofp %125 : vector<8x8xi32> to vector<8x8xf32>
    %127 = vector.shape_cast %116 : vector<64x4xf32> to vector<8x8x4xf32>
    %128 = vector.shape_cast %126 : vector<8x8xf32> to vector<8x8x1xf32>
    %129 = vector.broadcast %128 : vector<8x8x1xf32> to vector<8x8x4xf32>
    %130 = arith.mulf %129, %127 : vector<8x8x4xf32>
    %cst_50 = arith.constant dense<0.000000e+00> : vector<8x4xf32>
    %131 = vector.multi_reduction <add>, %130, %cst_50 [1] : vector<8x8x4xf32> to vector<8x4xf32>
    %cst_51 = arith.constant dense<0.000000e+00> : vector<8xf32>
    %132 = vector.multi_reduction <add>, %131, %cst_51 [1] : vector<8x4xf32> to vector<8xf32>
    %133 = vector.shape_cast %132 : vector<8xf32> to vector<8x1xf32>
    %cst_52 = arith.constant 4.000000e+00 : f32
    %134 = vector.broadcast %cst_52 : f32 to vector<8x1xf32>
    %135 = arith.divf %133, %134 : vector<8x1xf32>
    %136 = vector.broadcast %135 : vector<8x1xf32> to vector<8x4xf32>
    %137 = arith.subf %131, %136 : vector<8x4xf32>
    %138 = arith.mulf %137, %137 : vector<8x4xf32>
    %cst_53 = arith.constant dense<0.000000e+00> : vector<8xf32>
    %139 = vector.multi_reduction <add>, %138, %cst_53 [1] : vector<8x4xf32> to vector<8xf32>
    %140 = vector.shape_cast %139 : vector<8xf32> to vector<8x1xf32>
    %cst_54 = arith.constant 3.000000e+00 : f32
    %141 = vector.broadcast %cst_54 : f32 to vector<8x1xf32>
    %142 = arith.divf %140, %141 : vector<8x1xf32>
    %143 = vector.broadcast %135 : vector<8x1xf32> to vector<8x4xf32>
    %144 = arith.subf %131, %143 : vector<8x4xf32>
    %145 = vector.broadcast %10 : vector<1x4xf32> to vector<8x4xf32>
    %146 = arith.mulf %145, %144 : vector<8x4xf32>
    %147 = math.sqrt %142 : vector<8x1xf32>
    %cst_55 = arith.constant 9.99999997E-7 : f32
    %148 = vector.broadcast %cst_55 : f32 to vector<8x1xf32>
    %149 = arith.addf %147, %148 : vector<8x1xf32>
    %150 = vector.broadcast %149 : vector<8x1xf32> to vector<8x4xf32>
    %151 = arith.divf %146, %150 : vector<8x4xf32>
    %152 = vector.broadcast %11 : vector<1x4xf32> to vector<8x4xf32>
    %153 = arith.addf %151, %152 : vector<8x4xf32>
    %cst_56 = arith.constant dense<0.000000e+00> : vector<8x1xf32>
    %154 = tpu.matmul %153, %16, %cst_56 {dimension_numbers = #tpu.dot_dimension_numbers<[1], [0], [0], [1], [0, 0, 1, 1], [], []>} : vector<8x4xf32>, vector<4x1xf32>, vector<8x1xf32> -> vector<8x1xf32>
    %155 = arith.negf %154 : vector<8x1xf32>
    %156 = math.exp %155 : vector<8x1xf32>
    %cst_57 = arith.constant 1.000000e+00 : f32
    %157 = vector.broadcast %cst_57 : f32 to vector<8x1xf32>
    %158 = arith.addf %157, %156 : vector<8x1xf32>
    %159 = arith.divf %157, %158 : vector<8x1xf32>
    %c0_58 = arith.constant 0 : index
    %c0_59 = arith.constant 0 : index
    %160 = vector.load %arg7[%c0_58, %c0_59] : memref<8x1xf32, #tpu.memory_space<vmem>>, vector<8x1xf32>
    tpu.vector_store %arg7[%c0_58, %c0_59], %159 {strides = array<i32>} : memref<8x1xf32, #tpu.memory_space<vmem>>, vector<8x1xf32>,
    return
  }
  func.func @transform_0(%arg0: i32) -> (i32, i32) {
    %c0_i32 = arith.constant 0 : i32
    %c0_i32_0 = arith.constant 0 : i32
    return %arg0, %c0_i32 : i32, i32
  }
  func.func @transform_1(%arg0: i32) -> (i32, i32) {
    %c0_i32 = arith.constant 0 : i32
    %c0_i32_0 = arith.constant 0 : i32
    return %arg0, %c0_i32 : i32, i32
  }
  func.func @transform_2(%arg0: i32) -> (i32, i32) {
    %c0_i32 = arith.constant 0 : i32
    %c0_i32_0 = arith.constant 0 : i32
    %c0_i32_1 = arith.constant 0 : i32
    return %c0_i32, %c0_i32_0 : i32, i32
  }
  func.func @transform_3(%arg0: i32) -> (i32, i32) {
    %c0_i32 = arith.constant 0 : i32
    %c0_i32_0 = arith.constant 0 : i32
    %c0_i32_1 = arith.constant 0 : i32
    return %c0_i32, %c0_i32_0 : i32, i32
  }
  func.func @transform_4(%arg0: i32) -> (i32, i32) {
    %c0_i32 = arith.constant 0 : i32
    %c0_i32_0 = arith.constant 0 : i32
    %c0_i32_1 = arith.constant 0 : i32
    return %c0_i32, %c0_i32_0 : i32, i32
  }
  func.func @transform_5(%arg0: i32) -> (i32, i32) {
    %c0_i32 = arith.constant 0 : i32
    %c0_i32_0 = arith.constant 0 : i32
    %c0_i32_1 = arith.constant 0 : i32
    return %c0_i32, %c0_i32_0 : i32, i32
  }
  func.func @transform_6(%arg0: i32) -> (i32, i32) {
    %c0_i32 = arith.constant 0 : i32
    %c0_i32_0 = arith.constant 0 : i32
    return %arg0, %c0_i32 : i32, i32
  }
}

</mosaic_0001>

<bundles_post_ra>
// kernel: tpu_custom_call.1
= control target key start
LH: loop header
LB: loop body
LE: loop exit
PB: predicated region body
PF: predicated region fallthrough
CT: control target
= control target key end

     0   :  { %v42_v0 = vlaneseq  ;;  %vm149_vm0 = vcmask 1043456   ;;  %vm124_vm1 = vcmask 31744   ;;  %v2426_v14 = vmov 0.0   ;;  %s2429_s8 = smov 4   ;;  %s2430_s9 = smov 124   ;;  %s3285_s0 = inlined_call_operand.vmem [shape: s32[8,8], index: 0, kind: input, shape index: {}]   ;;  %s3286_s2 = inlined_call_operand.vmem [shape: f32[12,4], index: 2, kind: input, shape index: {}]   ;;  %s3287_s5 = inlined_call_operand.vmem [shape: f32[12,8], index: 5, kind: input, shape index: {}]   ;;  %s3288_s3 = inlined_call_operand.vmem [shape: f32[4,16], index: 3, kind: input, shape index: {}]   ;;  %s3289_s1 = inlined_call_operand.vmem [shape: s32[8,1], index: 1, kind: input, shape index: {}]   ;;  %s3290_s4 = inlined_call_operand.vmem [shape: f32[16,8], index: 4, kind: input, shape index: {}]   ;;  %s3291_s6 = inlined_call_operand.vmem [shape: f32[8,1], index: 6, kind: output, shape index: {}]  }
   0x1   :  { %v41_v2 = vld [vmem:[%s3285_s0] sm:$0xff]  ;;  %v2427_v63 = vmov 4.0   ;;  %s2431_s14 = smov 8   ;;  %s2432_s15 = smov 120  }
   0x2   :  { %v2470_v1 = vshrl.u32 %v42_v0, 7  ;;  %v44_v3 = vperm.slane %v41_v2, 0  ;;  %v58_v4 = vperm.slane %v41_v2, 2  ;;  %v72_v5 = vperm.slane %v41_v2, 4  ;;  %v23_v11 = vld [vmem:[%s3286_s2] sm:$0xf] }
   0x3   :  { %v51_v6 = vperm.slane %v41_v2, 1  ;;  %v65_v7 = vperm.slane %v41_v2, 3  ;;  %v79_v8 = vperm.slane %v41_v2, 5  ;;  %v93_v9 = vperm.slane %v41_v2, 7  ;;  %2187 = vmatpush.msk.msra.mxu0 %vm149_vm0, %v23_v11  ;;  %2260 = vmatpush.msk.msra.mxu3 %vm149_vm0, %v23_v11  ;;  %v24_v30 = vld [vmem:[%s3286_s2 + $0x4] sm:$0xff]  ;;  %s2433_s16 = smov 116  }
   0x4   :  { %2271 = vset.pattern.permute.xlu0 %v2470_v1  ;;  %2272 = vset.pattern.permute.xlu1 %v2470_v1  ;;  %v86_v10 = vperm.slane %v41_v2, 6  ;;  %v2483_v12 = vand.u32 127, %v42_v0  ;;  %2318 = vrcp.f32 %v2427_v63 }
   0x5   :  { %2273 = vset.pattern.permute.xlu2 %v2470_v1 }
   0xa   :  { %v2319_v0 = vpop.eup %2318 }
   0xb   :  { %v235_v2 = vmul.f32 4.0, %v2319_v0  ;;  %vm239_vm10 = vweird.f32 %v2319_v0 }
   0xc   :  { %49 = vperm.xlu0 %2271, %v44_v3   ;;  %63 = vperm.xlu1 %2272, %v58_v4  }
   0xd   :  { %77 = vperm.xlu2 %2273, %v72_v5   ;;  %v236_v3 = vsub.f32 1.0, %v235_v2 }
   0xf   :  { %v237_v4 = vmul.f32 %v2319_v0, %v236_v3 }
  0x11   :  { %v238_v5 = vadd.f32 %v2319_v0, %v237_v4 }
  0x14   :  { %56 = vperm.xlu0 %2271, %v51_v6   ;;  %70 = vperm.xlu1 %2272, %v65_v7   ;;  %v2544_v6 = vsel %vm239_vm10, %v2319_v0, %v238_v5 }
  0x15   :  { %84 = vperm.xlu2 %2273, %v79_v8  }
  0x1c   :  { %98 = vperm.xlu0 %2271, %v93_v9   ;;  %91 = vperm.xlu1 %2272, %v86_v10  }
  0x67   :  { %v78_v24 = vpop.permute.xlu2 %77 }
  0x68   :  { %vm104_vm7 = vcmp.eq.s32.totalorder %v2483_v12, %v78_v24 }
  0x69   :  { %v2183_v25 = vsel %vm104_vm7, 1.0, %v2426_v14 }
  0x6f   :  { %v85_v26 = vpop.permute.xlu2 %84 }
  0x70   :  { %vm105_vm8 = vcmp.eq.s32.totalorder %v2483_v12, %v85_v26 }
  0x71   :  { %v2184_v27 = vsel %vm105_vm8, 1.0, %v2426_v14 }
  0x7e   :  { %v50_v13 = vpop.permute.xlu0 %49  ;;  %v64_v17 = vpop.permute.xlu1 %63 }
  0x7f   :  { %vm100_vm2 = vcmp.eq.s32.totalorder %v2483_v12, %v50_v13  ;;  %vm102_vm4 = vcmp.eq.s32.totalorder %v2483_v12, %v64_v17 }
  0x80   :  { %v2179_v15 = vsel %vm100_vm2, 1.0, %v2426_v14  ;;  %v2181_v19 = vsel %vm102_vm4, 1.0, %v2426_v14 }
  0x81   :  { %2188 = vmatmul.msk.f32.vlgmr.msra.gmra.mxu0 %vm124_vm1, %v2179_v15 }
  0x86   :  { %v57_v16 = vpop.permute.xlu0 %56  ;;  %v71_v22 = vpop.permute.xlu1 %70 }
  0x87   :  { %vm101_vm3 = vcmp.eq.s32.totalorder %v2483_v12, %v57_v16  ;;  %vm103_vm6 = vcmp.eq.s32.totalorder %v2483_v12, %v71_v22 }
  0x88   :  { %v2180_v18 = vsel %vm101_vm3, 1.0, %v2426_v14  ;;  %v2182_v23 = vsel %vm103_vm6, 1.0, %v2426_v14 }
  0x89   :  { %2189 = vmatmul.msk.f32.gmra.mxu0 %vm124_vm1, %v2180_v18 }
  0x8e   :  { %v99_v20 = vpop.permute.xlu0 %98  ;;  %v92_v28 = vpop.permute.xlu1 %91 }
  0x8f   :  { %vm107_vm5 = vcmp.eq.s32.totalorder %v2483_v12, %v99_v20  ;;  %vm106_vm9 = vcmp.eq.s32.totalorder %v2483_v12, %v92_v28 }
  0x90   :  { %v2186_v21 = vsel %vm107_vm5, 1.0, %v2426_v14  ;;  %v2185_v29 = vsel %vm106_vm9, 1.0, %v2426_v14 }
  0x91   :  { %2190 = vmatmul.msk.f32.gmra.mxu0 %vm124_vm1, %v2181_v19  ;;  %2195 = vmatmul.msk.f32.vlgmr.msra.gmra.mxu3 %vm124_vm1, %v2186_v21 }
  0x99   :  { %2191 = vmatmul.msk.f32.gmra.mxu0 %vm124_vm1, %v2182_v23 }
  0xa1   :  { %2192 = vmatmul.msk.f32.gmra.mxu0 %vm124_vm1, %v2183_v25 }
  0xa9   :  { %2193 = vmatmul.msk.f32.gmra.mxu0 %vm124_vm1, %v2184_v27 }
  0xb1   :  { %2194 = vmatmul.msk.f32.gmra.mxu0 %vm124_vm1, %v2185_v29 }
  0xfe   :  { %v170_v31 = vpop.f32.mrf.mxu0 }
  0xff   :  { %v194_v32 = vmul.f32 2.0, %v170_v31 }
 0x101   :  { %v2512_v33 = vadd.f32 %v194_v32, %v24_v30 }
 0x103   :  { %v210_v34 = vsel %vm124_vm1, %v2512_v33, 0.0 }
 0x104   :  { %211 = vadd.xlane.f32.xlu2 %v210_v34 }
 0x106   :  { %v173_v35 = vpop.f32.mrf.mxu0 }
 0x107   :  { %v195_v36 = vmul.f32 2.0, %v173_v35 }
 0x109   :  { %v2516_v37 = vadd.f32 %v195_v36, %v24_v30 }
 0x10b   :  { %v213_v38 = vsel %vm124_vm1, %v2516_v37, 0.0 }
 0x10c   :  { %214 = vadd.xlane.f32.xlu0 %v213_v38 }
 0x10e   :  { %v176_v39 = vpop.f32.mrf.mxu0 }
 0x10f   :  { %v196_v40 = vmul.f32 2.0, %v176_v39 }
 0x111   :  { %v2520_v41 = vadd.f32 %v196_v40, %v24_v30 }
 0x113   :  { %v216_v42 = vsel %vm124_vm1, %v2520_v41, 0.0 }
 0x114   :  { %217 = vadd.xlane.f32.xlu1 %v216_v42  ;;  %v191_v53 = vpop.f32.mrf.mxu3 }
 0x115   :  { %v201_v55 = vmul.f32 2.0, %v191_v53 }
 0x116   :  { %v179_v43 = vpop.f32.mrf.mxu0 }
 0x117   :  { %v197_v44 = vmul.f32 2.0, %v179_v43  ;;  %v2536_v58 = vadd.f32 %v201_v55, %v24_v30  ;;  %v2428_v55 = vmov 3.0  }
 0x118   :  { %2320 = vrcp.f32 %v2428_v55 }
 0x119   :  { %v2524_v45 = vadd.f32 %v197_v44, %v24_v30  ;;  %v231_v62 = vsel %vm124_vm1, %v2536_v58, 0.0 }
 0x11b   :  { %v219_v46 = vsel %vm124_vm1, %v2524_v45, 0.0 }
 0x11c   :  { %220 = vadd.xlane.f32.xlu2 %v219_v46 }
 0x11e   :  { %v182_v47 = vpop.f32.mrf.mxu0 }
 0x11f   :  { %v198_v48 = vmul.f32 2.0, %v182_v47 }
 0x121   :  { %v2528_v49 = vadd.f32 %v198_v48, %v24_v30 }
 0x123   :  { %v222_v50 = vsel %vm124_vm1, %v2528_v49, 0.0 }
 0x124   :  { %223 = vadd.xlane.f32.xlu2 %v222_v50 }
 0x126   :  { %v185_v51 = vpop.f32.mrf.mxu0 }
 0x127   :  { %v199_v52 = vmul.f32 2.0, %v185_v51 }
 0x129   :  { %v2532_v54 = vadd.f32 %v199_v52, %v24_v30 }
 0x12b   :  { %v225_v56 = vsel %vm124_vm1, %v2532_v54, 0.0 }
 0x12c   :  { %226 = vadd.xlane.f32.xlu0 %v225_v56  ;;  %v2321_v56 = vpop.eup %2320 }
 0x12d   :  { %vm294_vm11 = vweird.f32 %v2321_v56 }
 0x12e   :  { %v188_v57 = vpop.f32.mrf.mxu0 }
 0x12f   :  { %v200_v59 = vmul.f32 2.0, %v188_v57  ;;  %v290_v57 = vmul.f32 3.0, %v2321_v56 }
 0x131   :  { %v2538_v60 = vadd.f32 %v200_v59, %v24_v30  ;;  %v291_v59 = vsub.f32 1.0, %v290_v57 }
 0x133   :  { %v228_v61 = vsel %vm124_vm1, %v2538_v60, 0.0 }
 0x134   :  { %229 = vadd.xlane.f32.xlu2 %v228_v61  ;;  %232 = vadd.xlane.f32.xlu0 %v231_v62  ;;  %v292_v61 = vmul.f32 %v2321_v56, %v291_v59 }
 0x136   :  { %v293_v62 = vadd.f32 %v2321_v56, %v292_v61 }
 0x138   :  { %v2602_v63 = vsel %vm294_vm11, %v2321_v56, %v293_v62 }
 0x177   :  { %v212_v7 = vpop.xlane.xlu2 %211 }
 0x178   :  { %v241_v8 = vmul.f32 %v2544_v6, %v212_v7 }
 0x17a   :  { %v2548_v9 = vsub.f32 %v2512_v33, %v241_v8 }
 0x17c   :  { %v257_v10 = vmul.f32 %v2548_v9, %v2548_v9 }
 0x17e   :  { %v265_v11 = vsel %vm124_vm1, %v257_v10, 0.0  ;;  %v2609_v10 = vld [vmem:[%s3288_s3] sm:$0xf] }
 0x17f   :  { %266 = vadd.xlane.f32.xlu1 %v265_v11  ;;  %v215_v13 = vpop.xlane.xlu0 %214  ;;  %2196 = vmatpush.msk.msra.mxu1 %vm149_vm0, %v2609_v10 }
 0x180   :  { %v242_v15 = vmul.f32 %v2544_v6, %v215_v13  ;;  %2261 = vmatpush.msk.msrb.mxu3 %vm149_vm0, %v2609_v10 }
 0x182   :  { %v2555_v16 = vsub.f32 %v2516_v37, %v242_v15 }
 0x184   :  { %v258_v17 = vmul.f32 %v2555_v16, %v2555_v16 }
 0x186   :  { %v268_v18 = vsel %vm124_vm1, %v258_v17, 0.0 }
 0x187   :  { %v218_v19 = vpop.xlane.xlu1 %217  ;;  %269 = vadd.xlane.f32.xlu1 %v268_v18 }
 0x188   :  { %v243_v20 = vmul.f32 %v2544_v6, %v218_v19 }
 0x18a   :  { %v2562_v21 = vsub.f32 %v2520_v41, %v243_v20 }
 0x18c   :  { %v259_v22 = vmul.f32 %v2562_v21, %v2562_v21 }
 0x18e   :  { %v271_v23 = vsel %vm124_vm1, %v259_v22, 0.0 }
 0x18f   :  { %v221_v24 = vpop.xlane.xlu2 %220  ;;  %272 = vadd.xlane.f32.xlu2 %v271_v23 }
 0x190   :  { %v244_v25 = vmul.f32 %v2544_v6, %v221_v24 }
 0x192   :  { %v2569_v26 = vsub.f32 %v2524_v45, %v244_v25 }
 0x194   :  { %v260_v27 = vmul.f32 %v2569_v26, %v2569_v26 }
 0x196   :  { %v274_v28 = vsel %vm124_vm1, %v260_v27, 0.0 }
 0x197   :  { %v224_v29 = vpop.xlane.xlu2 %223  ;;  %275 = vadd.xlane.f32.xlu0 %v274_v28 }
 0x198   :  { %v245_v30 = vmul.f32 %v2544_v6, %v224_v29 }
 0x19a   :  { %v2576_v31 = vsub.f32 %v2528_v49, %v245_v30 }
 0x19c   :  { %v261_v32 = vmul.f32 %v2576_v31, %v2576_v31 }
 0x19e   :  { %v277_v34 = vsel %vm124_vm1, %v261_v32, 0.0 }
 0x19f   :  { %278 = vadd.xlane.f32.xlu1 %v277_v34  ;;  %v227_v35 = vpop.xlane.xlu0 %226 }
 0x1a0   :  { %v246_v36 = vmul.f32 %v2544_v6, %v227_v35 }
 0x1a2   :  { %v2583_v38 = vsub.f32 %v2532_v54, %v246_v36 }
 0x1a4   :  { %v262_v39 = vmul.f32 %v2583_v38, %v2583_v38 }
 0x1a6   :  { %v280_v40 = vsel %vm124_vm1, %v262_v39, 0.0 }
 0x1a7   :  { %v230_v42 = vpop.xlane.xlu2 %229  ;;  %281 = vadd.xlane.f32.xlu2 %v280_v40  ;;  %v233_v43 = vpop.xlane.xlu0 %232 }
 0x1a8   :  { %v247_v44 = vmul.f32 %v2544_v6, %v230_v42  ;;  %v248_v46 = vmul.f32 %v2544_v6, %v233_v43 }
 0x1aa   :  { %v2591_v47 = vsub.f32 %v2538_v60, %v247_v44  ;;  %v2594_v48 = vsub.f32 %v2536_v58, %v248_v46 }
 0x1ac   :  { %v263_v50 = vmul.f32 %v2591_v47, %v2591_v47  ;;  %v264_v51 = vmul.f32 %v2594_v48, %v2594_v48 }
 0x1ae   :  { %v283_v52 = vsel %vm124_vm1, %v263_v50, 0.0  ;;  %v286_v53 = vsel %vm124_vm1, %v264_v51, 0.0 }
 0x1af   :  { %284 = vadd.xlane.f32.xlu0 %v283_v52  ;;  %287 = vadd.xlane.f32.xlu1 %v286_v53 }
 0x1f2   :  { %v267_v0 = vpop.xlane.xlu1 %266 }
 0x1f3   :  { %v296_v2 = vmul.f32 %v2602_v63, %v267_v0 }
 0x1f5   :  { %2322 = vrsqrt.f32 %v296_v2  ;;  %vm320_vm12 = vcmp.eq.f32.partialorder %v296_v2, inf  ;;  %v323_v24 = vand.u32 2147483648, %v296_v2  ;;  %vm322_vm13 = vcmp.eq.f32.partialorder %v296_v2, 0.0 }
 0x1fa   :  { %v270_v3 = vpop.xlane.xlu1 %269 }
 0x1fb   :  { %v2323_v4 = vpop.eup %2322  ;;  %v297_v5 = vmul.f32 %v2602_v63, %v270_v3 }
 0x1fc   :  { %v314_v7 = vmul.f32 %v2323_v4, %v296_v2 }
 0x1fd   :  { %2324 = vrsqrt.f32 %v297_v5  ;;  %vm332_vm14 = vcmp.eq.f32.partialorder %v297_v5, inf  ;;  %v335_v43 = vand.u32 2147483648, %v297_v5  ;;  %vm334_vm15 = vcmp.eq.f32.partialorder %v297_v5, 0.0 }
 0x1fe   :  { %v315_v8 = vmul.f32 %v2323_v4, %v314_v7 }
 0x200   :  { %v316_v11 = vmul.f32 0.5, %v315_v8 }
 0x202   :  { %v317_v13 = vsub.f32 1.5, %v316_v11  ;;  %v273_v15 = vpop.xlane.xlu2 %272 }
 0x203   :  { %v2325_v17 = vpop.eup %2324  ;;  %v298_v18 = vmul.f32 %v2602_v63, %v273_v15 }
 0x204   :  { %v318_v19 = vmul.f32 %v2323_v4, %v317_v13  ;;  %v326_v20 = vmul.f32 %v2325_v17, %v297_v5 }
 0x205   :  { %2326 = vrsqrt.f32 %v298_v18  ;;  %vm344_vm2 = vcmp.eq.f32.partialorder %v298_v18, inf  ;;  %v347_v7 = vand.u32 2147483648, %v298_v18  ;;  %vm346_vm4 = vcmp.eq.f32.partialorder %v298_v18, 0.0 }
 0x206   :  { %v319_v22 = vmul.f32 %v318_v19, %v296_v2  ;;  %v327_v23 = vmul.f32 %v2325_v17, %v326_v20 }
 0x208   :  { %v328_v25 = vmul.f32 0.5, %v327_v23  ;;  %v321_v27 = vsel %vm320_vm12, %v296_v2, %v319_v22  ;;  %v2631_v2 = vld [vmem:[%s3287_s5 + $0x4] ss:$0 sm:$0xff] }
 0x209   :  { %v324_v28 = vsel %vm322_vm13, %v323_v24, %v321_v27  ;;  %v305_v22 = vmul.f32 %v2631_v2, %v2548_v9 }
 0x20a   :  { %v329_v29 = vsub.f32 1.5, %v328_v25  ;;  %v276_v30 = vpop.xlane.xlu0 %275  ;;  %v409_v32 = vadd.f32 1e-06, %v324_v28 }
 0x20b   :  { %v2327_v34 = vpop.eup %2326  ;;  %v2617_v35 = vmul.f32 %v2602_v63, %v276_v30 }
 0x20c   :  { %v330_v36 = vmul.f32 %v2325_v17, %v329_v29  ;;  %v338_v39 = vmul.f32 %v2327_v34, %v298_v18  ;;  %2328 = vrcp.f32 %v409_v32  ;;  %v426_v11 = vand.u32 2147483647, %v409_v32 }
 0x20d   :  { %2330 = vrsqrt.f32 %v2617_v35  ;;  %vm422_vm5 = vweird.f32 %v409_v32  ;;  %vm356_vm8 = vcmp.eq.f32.partialorder %v2617_v35, inf  ;;  %vm358_vm9 = vcmp.eq.f32.partialorder %v2617_v35, 0.0 }
 0x20e   :  { %v331_v40 = vmul.f32 %v330_v36, %v297_v5  ;;  %v339_v42 = vmul.f32 %v2327_v34, %v338_v39  ;;  %vm427_vm7 = vcmp.eq.f32.partialorder %v426_v11, 8.507059e+37 }
 0x210   :  { %v340_v44 = vmul.f32 0.5, %v339_v42  ;;  %v333_v46 = vsel %vm332_vm14, %v297_v5, %v331_v40  ;;  %v428_v5 = vand.u32 2147483648, %v409_v32 }
 0x211   :  { %v336_v50 = vsel %vm334_vm15, %v335_v43, %v333_v46 }
 0x212   :  { %v2329_v51 = vpop.eup %2328  ;;  %v341_v52 = vsub.f32 1.5, %v340_v44  ;;  %v279_v53 = vpop.xlane.xlu1 %278  ;;  %v2620_v55 = vadd.f32 1e-06, %v336_v50  ;;  %v429_v25 = vor.u32 1.1754944e-38, %v428_v5  ;;  %v359_v44 = vand.u32 2147483648, %v2617_v35 }
 0x213   :  { %v2331_v56 = vpop.eup %2330  ;;  %v2623_v57 = vmul.f32 %v2602_v63, %v279_v53  ;;  %v418_v59 = vmul.f32 %v2329_v51, %v409_v32  ;;  %vm423_vm3 = vweird.f32 %v2329_v51  ;;  %v306_v53 = vmul.f32 %v2631_v2, %v2555_v16 }
 0x214   :  { %v342_v61 = vmul.f32 %v2327_v34, %v341_v52  ;;  %v350_v62 = vmul.f32 %v2331_v56, %v2617_v35  ;;  %2332 = vrcp.f32 %v2620_v55  ;;  %vm424_vm6 = vmor %vm422_vm5, %vm423_vm3  ;;  %vm437_vm11 = vweird.f32 %v2620_v55 }
 0x215   :  { %2334 = vrsqrt.f32 %v2623_v57  ;;  %v419_v0 = vsub.f32 1.0, %v418_v59  ;;  %v443_v59 = vand.u32 2147483648, %v2620_v55  ;;  %v307_v16 = vmul.f32 %v2631_v2, %v2562_v21 }
 0x216   :  { %v343_v3 = vmul.f32 %v342_v61, %v298_v18  ;;  %v351_v4 = vmul.f32 %v2331_v56, %v350_v62  ;;  %vm368_vm13 = vcmp.eq.f32.partialorder %v2623_v57, inf }
 0x217   :  { %v420_v8 = vmul.f32 %v2329_v51, %v419_v0 }
 0x218   :  { %v352_v13 = vmul.f32 0.5, %v351_v4  ;;  %v345_v15 = vsel %vm344_vm2, %v298_v18, %v343_v3  ;;  %v2645_v18 = vld [vmem:[%s3287_s5 + $0x5] ss:$0 sm:$0xff]  ;;  %vm370_vm2 = vcmp.eq.f32.partialorder %v2623_v57, 0.0 }
 0x219   :  { %v421_v17 = vadd.f32 %v2329_v51, %v420_v8  ;;  %v348_v19 = vsel %vm346_vm4, %v347_v7, %v345_v15 }
 0x21a   :  { %v2633_v20 = vpop.eup %2332  ;;  %v353_v23 = vsub.f32 1.5, %v352_v13  ;;  %v282_v24 = vpop.xlane.xlu2 %281  ;;  %v2637_v27 = vadd.f32 1e-06, %v348_v19  ;;  %v2308_v19 = vld [vmem:[%s3287_s5 + $0x1] ss:$0 sm:$0xff] }
 0x21b   :  { %v2335_v28 = vpop.eup %2334  ;;  %v2640_v29 = vmul.f32 %v2602_v63, %v282_v24  ;;  %v425_v30 = vsel %vm424_vm6, %v2329_v51, %v421_v17  ;;  %v433_v9 = vmul.f32 %v2633_v20, %v2620_v55  ;;  %vm438_vm10 = vweird.f32 %v2633_v20  ;;  %625 = vrot.lane.b32.xlu2 %v2308_v19, %s2429_s8 }
 0x21c   :  { %v354_v32 = vmul.f32 %v2331_v56, %v353_v23  ;;  %v362_v34 = vmul.f32 %v2335_v28, %v2623_v57  ;;  %v430_v36 = vsel %vm427_vm7, %v429_v25, %v425_v30  ;;  %2336 = vrcp.f32 %v2637_v27  ;;  %vm2681_vm12 = vmor %vm437_vm11, %vm438_vm10 }
 0x21d   :  { %2338 = vrsqrt.f32 %v2640_v29  ;;  %v431_v39 = vmul.f32 %v430_v36, %v305_v22  ;;  %v434_v43 = vsub.f32 1.0, %v433_v9  ;;  %v441_v56 = vand.u32 2147483647, %v2620_v55 }
 0x21e   :  { %v355_v40 = vmul.f32 %v354_v32, %v2617_v35  ;;  %v363_v42 = vmul.f32 %v2335_v28, %v362_v34  ;;  %v444_v22 = vor.u32 1.1754944e-38, %v443_v59  ;;  %v456_v25 = vand.u32 2147483647, %v2637_v27 }
 0x21f   :  { %v538_v46 = vadd.f32 %v2645_v18, %v431_v39  ;;  %v435_v51 = vmul.f32 %v2633_v20, %v434_v43  ;;  %vm442_vm14 = vcmp.eq.f32.partialorder %v441_v56, 8.507059e+37  ;;  %v458_v9 = vand.u32 2147483648, %v2637_v27 }
 0x220   :  { %v364_v50 = vmul.f32 0.5, %v363_v42  ;;  %v357_v52 = vsel %vm356_vm8, %v2617_v35, %v355_v40  ;;  %vm380_vm15 = vcmp.eq.f32.partialorder %v2640_v29, inf  ;;  %v383_v36 = vand.u32 2147483648, %v2640_v29 }
 0x221   :  { %2197 = vmatmul.msk.f32.vlgmr.msra.gmra.mxu1 %vm124_vm1, %v538_v46  ;;  %v360_v61 = vsel %vm358_vm9, %v359_v44, %v357_v52  ;;  %v436_v5 = vadd.f32 %v2633_v20, %v435_v51  ;;  %vm452_vm4 = vweird.f32 %v2637_v27  ;;  %vm2712_vm5 = vcmp.eq.f32.partialorder %v456_v25, 8.507059e+37 }
 0x222   :  { %v2665_v62 = vpop.eup %2336  ;;  %v365_v0 = vsub.f32 1.5, %v364_v50  ;;  %v288_v3 = vpop.xlane.xlu1 %287  ;;  %v2669_v35 = vadd.f32 1e-06, %v360_v61  ;;  %v459_v52 = vor.u32 1.1754944e-38, %v458_v9  ;;  %vm382_vm9 = vcmp.eq.f32.partialorder %v2640_v29, 0.0 }
 0x223   :  { %v285_v4 = vpop.xlane.xlu0 %284  ;;  %v2339_v7 = vpop.eup %2338  ;;  %v2674_v8 = vmul.f32 %v2602_v63, %v288_v3  ;;  %v448_v55 = vmul.f32 %v2665_v62, %v2637_v27  ;;  %v440_v21 = vsel %vm2681_vm12, %v2633_v20, %v436_v5  ;;  %v371_v20 = vand.u32 2147483648, %v2623_v57 }
 0x224   :  { %v2677_v11 = vmul.f32 %v2602_v63, %v285_v4  ;;  %v366_v15 = vmul.f32 %v2335_v28, %v365_v0  ;;  %v374_v17 = vmul.f32 %v2339_v7, %v2640_v29  ;;  %2340 = vrcp.f32 %v2669_v35 }
 0x225   :  { %2342 = vrsqrt.f32 %v2674_v8  ;;  %v445_v28 = vsel %vm442_vm14, %v444_v22, %v440_v21  ;;  %v449_v30 = vsub.f32 1.0, %v448_v55  ;;  %vm453_vm3 = vweird.f32 %v2665_v62 }
 0x226   :  { %v367_v23 = vmul.f32 %v366_v15, %v2623_v57  ;;  %v375_v24 = vmul.f32 %v2339_v7, %v374_v17  ;;  %2344 = vrsqrt.f32 %v2677_v11  ;;  %v446_v34 = vmul.f32 %v445_v28, %v306_v53  ;;  %vm454_vm6 = vmor %vm452_vm4, %vm453_vm3 }
 0x227   :  { %v450_v39 = vmul.f32 %v2665_v62, %v449_v30  ;;  %v471_v27 = vand.u32 2147483647, %v2669_v35  ;;  %v473_v13 = vand.u32 2147483648, %v2669_v35  ;;  %vm467_vm8 = vweird.f32 %v2669_v35 }
 0x228   :  { %v376_v32 = vmul.f32 0.5, %v375_v24  ;;  %v369_v40 = vsel %vm368_vm13, %v2623_v57, %v367_v23  ;;  %v539_v44 = vadd.f32 %v2645_v18, %v446_v34  ;;  %v308_v9 = vmul.f32 %v2631_v2, %v2569_v26 }
 0x229   :  { %v451_v51 = vadd.f32 %v2665_v62, %v450_v39  ;;  %v372_v56 = vsel %vm370_vm2, %v371_v20, %v369_v40  ;;  %v474_v30 = vor.u32 1.1754944e-38, %v473_v13  ;;  %vm472_vm11 = vcmp.eq.f32.partialorder %v471_v27, 8.507059e+37 }
 0x22a   :  { %v2341_v42 = vpop.eup %2340  ;;  %v377_v43 = vsub.f32 1.5, %v376_v32  ;;  %2198 = vmatmul.msk.f32.gmra.mxu1 %vm124_vm1, %v539_v44  ;;  %v2723_v0 = vadd.f32 1e-06, %v372_v56  ;;  %vm404_vm12 = vcmp.eq.f32.partialorder %v2674_v8, inf  ;;  %vm406_vm13 = vcmp.eq.f32.partialorder %v2674_v8, 0.0 }
 0x22b   :  { %v2343_v50 = vpop.eup %2342  ;;  %v463_v53 = vmul.f32 %v2341_v42, %v2669_v35  ;;  %v455_v4 = vsel %vm454_vm6, %v2665_v62, %v451_v51  ;;  %vm468_vm7 = vweird.f32 %v2341_v42  ;;  %v407_v26 = vand.u32 2147483648, %v2674_v8 }
 0x22c   :  { %v2345_v59 = vpop.eup %2344  ;;  %v378_v61 = vmul.f32 %v2339_v7, %v377_v43  ;;  %v398_v57 = vmul.f32 %v2343_v50, %v2674_v8  ;;  %v460_v15 = vsel %vm2712_vm5, %v459_v52, %v455_v4  ;;  %2346 = vrcp.f32 %v2723_v0  ;;  %vm469_vm10 = vmor %vm467_vm8, %vm468_vm7 }
 0x22d   :  { %v386_v3 = vmul.f32 %v2345_v59, %v2677_v11  ;;  %v464_v5 = vsub.f32 1.0, %v463_v53  ;;  %v461_v21 = vmul.f32 %v460_v15, %v307_v16  ;;  %vm392_vm14 = vcmp.eq.f32.partialorder %v2677_v11, inf }
 0x22e   :  { %v379_v7 = vmul.f32 %v378_v61, %v2640_v29  ;;  %v399_v55 = vmul.f32 %v2343_v50, %v398_v57  ;;  %v395_v46 = vand.u32 2147483648, %v2677_v11  ;;  %v486_v53 = vand.u32 2147483647, %v2723_v0 }
 0x22f   :  { %v387_v17 = vmul.f32 %v2345_v59, %v386_v3  ;;  %v465_v19 = vmul.f32 %v2341_v42, %v464_v5  ;;  %v540_v24 = vadd.f32 %v2645_v18, %v461_v21  ;;  %v488_v56 = vand.u32 2147483648, %v2723_v0 }
 0x230   :  { %v400_v22 = vmul.f32 0.5, %v399_v55  ;;  %v381_v62 = vsel %vm380_vm15, %v2640_v29, %v379_v7  ;;  %vm394_vm15 = vcmp.eq.f32.partialorder %v2677_v11, 0.0  ;;  %vm482_vm3 = vweird.f32 %v2723_v0 }
 0x231   :  { %v388_v23 = vmul.f32 0.5, %v387_v17  ;;  %v466_v25 = vadd.f32 %v2341_v42, %v465_v19  ;;  %v384_v20 = vsel %vm382_vm9, %v383_v36, %v381_v62  ;;  %v489_v55 = vor.u32 1.1754944e-38, %v488_v56 }
 0x232   :  { %v401_v28 = vsub.f32 1.5, %v400_v22  ;;  %v414_v16 = vadd.f32 1e-06, %v384_v20  ;;  %v2347_v34 = vpop.eup %2346  ;;  %2199 = vmatmul.msk.f32.gmra.mxu1 %vm124_vm1, %v540_v24  ;;  %vm487_vm5 = vcmp.eq.f32.partialorder %v486_v53, 8.507059e+37  ;;  %v310_v20 = vmul.f32 %v2631_v2, %v2583_v38 }
 0x233   :  { %v389_v32 = vsub.f32 1.5, %v388_v23  ;;  %v470_v35 = vsel %vm469_vm10, %v2341_v42, %v466_v25  ;;  %v478_v43 = vmul.f32 %v2347_v34, %v2723_v0  ;;  %vm483_vm2 = vweird.f32 %v2347_v34 }
 0x234   :  { %v402_v39 = vmul.f32 %v2343_v50, %v401_v28  ;;  %v475_v29 = vsel %vm472_vm11, %v474_v30, %v470_v35  ;;  %2348 = vrcp.f32 %v414_v16  ;;  %vm484_vm4 = vmor %vm482_vm3, %vm483_vm2  ;;  %v503_v21 = vand.u32 2147483648, %v414_v16 }
 0x235   :  { %v390_v40 = vmul.f32 %v2345_v59, %v389_v32  ;;  %v476_v36 = vmul.f32 %v475_v29, %v308_v9  ;;  %v479_v50 = vsub.f32 1.0, %v478_v43  ;;  %v501_v0 = vand.u32 2147483647, %v414_v16 }
 0x236   :  { %v403_v44 = vmul.f32 %v402_v39, %v2674_v8  ;;  %vm497_vm7 = vweird.f32 %v414_v16  ;;  %v504_v24 = vor.u32 1.1754944e-38, %v503_v21  ;;  %v311_v53 = vmul.f32 %v2631_v2, %v2591_v47 }
 0x237   :  { %v391_v42 = vmul.f32 %v390_v40, %v2677_v11  ;;  %v541_v52 = vadd.f32 %v2645_v18, %v476_v36  ;;  %v480_v59 = vmul.f32 %v2347_v34, %v479_v50  ;;  %vm502_vm9 = vcmp.eq.f32.partialorder %v501_v0, 8.507059e+37 }
 0x238   :  { %v405_v51 = vsel %vm404_vm12, %v2674_v8, %v403_v44  ;;  %v309_v8 = vmul.f32 %v2631_v2, %v2576_v31  ;;  %v312_v50 = vmul.f32 %v2631_v2, %v2594_v48 }
 0x239   :  { %v393_v61 = vsel %vm392_vm14, %v2677_v11, %v391_v42  ;;  %v408_v57 = vsel %vm406_vm13, %v407_v26, %v405_v51  ;;  %v481_v5 = vadd.f32 %v2347_v34, %v480_v59 }
 0x23a   :  { %v2349_v27 = vpop.eup %2348  ;;  %v396_v3 = vsel %vm394_vm15, %v395_v46, %v393_v61  ;;  %v416_v4 = vadd.f32 1e-06, %v408_v57  ;;  %2200 = vmatmul.msk.f32.gmra.mxu1 %vm124_vm1, %v541_v52 }
 0x23b   :  { %v493_v13 = vmul.f32 %v2349_v27, %v414_v16  ;;  %v415_v7 = vadd.f32 1e-06, %v396_v3  ;;  %v485_v15 = vsel %vm484_vm4, %v2347_v34, %v481_v5  ;;  %vm498_vm6 = vweird.f32 %v2349_v27 }
 0x23c   :  { %2350 = vrcp.f32 %v416_v4  ;;  %v490_v17 = vsel %vm487_vm5, %v489_v55, %v485_v15  ;;  %vm499_vm8 = vmor %vm497_vm7, %vm498_vm6  ;;  %v533_v29 = vand.u32 2147483648, %v416_v4  ;;  %v531_v36 = vand.u32 2147483647, %v416_v4 }
 0x23d   :  { %v494_v11 = vsub.f32 1.0, %v493_v13  ;;  %2352 = vrcp.f32 %v415_v7  ;;  %v491_v19 = vmul.f32 %v490_v17, %v309_v8  ;;  %v518_v40 = vand.u32 2147483648, %v415_v7 }
 0x23e   :  { %v516_v38 = vand.u32 2147483647, %v415_v7  ;;  %vm527_vm12 = vweird.f32 %v416_v4  ;;  %vm512_vm13 = vweird.f32 %v415_v7  ;;  %v534_v46 = vor.u32 1.1754944e-38, %v533_v29 }
 0x23f   :  { %v495_v22 = vmul.f32 %v2349_v27, %v494_v11  ;;  %v542_v62 = vadd.f32 %v2645_v18, %v491_v19  ;;  %v519_v51 = vor.u32 1.1754944e-38, %v518_v40  ;;  %vm532_vm2 = vcmp.eq.f32.partialorder %v531_v36, 8.507059e+37 }
 0x240   :  { %vm517_vm3 = vcmp.eq.f32.partialorder %v516_v38, 8.507059e+37  ;;  %vm881_vm4 = vcmask 64512  }
 0x241   :  { %v496_v23 = vadd.f32 %v2349_v27, %v495_v22 }
 0x242   :  { %v2351_v31 = vpop.eup %2350  ;;  %2201 = vmatmul.msk.f32.gmra.mxu1 %vm124_vm1, %v542_v62 }
 0x243   :  { %v2353_v25 = vpop.eup %2352  ;;  %v500_v28 = vsel %vm499_vm8, %v2349_v27, %v496_v23  ;;  %v523_v30 = vmul.f32 %v2351_v31, %v416_v4  ;;  %vm528_vm10 = vweird.f32 %v2351_v31  ;;  %v2309_v23 = vld [vmem:[%s3287_s5] ss:$0 sm:$0xff] }
 0x244   :  { %v505_v9 = vsel %vm502_vm9, %v504_v24, %v500_v28  ;;  %v508_v32 = vmul.f32 %v2353_v25, %v415_v7  ;;  %vm513_vm11 = vweird.f32 %v2353_v25  ;;  %vm529_vm14 = vmor %vm527_vm12, %vm528_vm10 }
 0x245   :  { %v506_v35 = vmul.f32 %v505_v9, %v310_v20  ;;  %v524_v34 = vsub.f32 1.0, %v523_v30  ;;  %vm514_vm15 = vmor %vm512_vm13, %vm513_vm11 }
 0x246   :  { %v509_v39 = vsub.f32 1.0, %v508_v32 }
 0x247   :  { %v525_v16 = vmul.f32 %v2351_v31, %v524_v34  ;;  %v543_v43 = vadd.f32 %v2645_v18, %v506_v35 }
 0x248   :  { %v510_v44 = vmul.f32 %v2353_v25, %v509_v39 }
 0x249   :  { %v526_v26 = vadd.f32 %v2351_v31, %v525_v16 }
 0x24a   :  { %v511_v42 = vadd.f32 %v2353_v25, %v510_v44  ;;  %2202 = vmatmul.msk.f32.gmra.mxu1 %vm124_vm1, %v543_v43 }
 0x24b   :  { %v530_v52 = vsel %vm529_vm14, %v2351_v31, %v526_v26 }
 0x24c   :  { %v515_v56 = vsel %vm514_vm15, %v2353_v25, %v511_v42  ;;  %v535_v59 = vsel %vm532_vm2, %v534_v46, %v530_v52 }
 0x24d   :  { %v520_v61 = vsel %vm517_vm3, %v519_v51, %v515_v56  ;;  %v536_v57 = vmul.f32 %v535_v59, %v312_v50 }
 0x24e   :  { %v521_v27 = vmul.f32 %v520_v61, %v311_v53 }
 0x24f   :  { %v545_v3 = vadd.f32 %v2645_v18, %v536_v57 }
 0x250   :  { %v544_v4 = vadd.f32 %v2645_v18, %v521_v27  ;;  %v2310_v27 = vld [vmem:[%s3287_s5 + $0x2] ss:$0 sm:$0xff] }
 0x251   :  { %2204 = vmatmul.msk.f32.vlgmr.msrb.gmra.mxu3 %vm124_vm1, %v545_v3 }
 0x252   :  { %2203 = vmatmul.msk.f32.gmra.mxu1 %vm124_vm1, %v544_v4 }
 0x275   :  { %v626_v48 = vpop.permute.xlu2 %625 }
 0x29e   :  { %v2773_v5 = vpop.f32.mrf.mxu1 }
 0x29f   :  { %v628_v47 = vadd.f32 %v626_v48, %v2773_v5  ;;  %v615_v24 = vadd.f32 %v2309_v23, %v2773_v5 }
 0x2a1   :  { %650 = vrot.lane.b32.xlu0 %v628_v47, %s2430_s9 }
 0x2a7   :  { %v2776_v2 = vpop.f32.mrf.mxu1 }
 0x2a8   :  { %v629_v13 = vadd.f32 %v626_v48, %v2776_v2  ;;  %v616_v20 = vadd.f32 %v2309_v23, %v2776_v2 }
 0x2aa   :  { %678 = vrot.lane.b32.xlu1 %v629_v13, %s2430_s9 }
 0x2af   :  { %v2779_v7 = vpop.f32.mrf.mxu1 }
 0x2b0   :  { %v630_v18 = vadd.f32 %v626_v48, %v2779_v7  ;;  %v617_v9 = vadd.f32 %v2309_v23, %v2779_v7 }
 0x2b2   :  { %706 = vrot.lane.b32.xlu0 %v630_v18, %s2430_s9 }
 0x2b7   :  { %v2782_v8 = vpop.f32.mrf.mxu1 }
 0x2b8   :  { %v631_v55 = vadd.f32 %v626_v48, %v2782_v8  ;;  %v618_v32 = vadd.f32 %v2309_v23, %v2782_v8 }
 0x2ba   :  { %734 = vrot.lane.b32.xlu2 %v631_v55, %s2430_s9 }
 0x2bf   :  { %v2785_v15 = vpop.f32.mrf.mxu1 }
 0x2c0   :  { %v632_v11 = vadd.f32 %v626_v48, %v2785_v15  ;;  %v619_v39 = vadd.f32 %v2309_v23, %v2785_v15 }
 0x2c2   :  { %762 = vrot.lane.b32.xlu1 %v632_v11, %s2430_s9 }
 0x2c7   :  { %v2788_v17 = vpop.f32.mrf.mxu1 }
 0x2c8   :  { %v633_v21 = vadd.f32 %v626_v48, %v2788_v17  ;;  %v620_v40 = vadd.f32 %v2309_v23, %v2788_v17 }
 0x2ca   :  { %790 = vrot.lane.b32.xlu0 %v633_v21, %s2430_s9 }
 0x2cf   :  { %v2791_v19 = vpop.f32.mrf.mxu1 }
 0x2d0   :  { %v634_v22 = vadd.f32 %v626_v48, %v2791_v19  ;;  %v621_v16 = vadd.f32 %v2309_v23, %v2791_v19 }
 0x2d2   :  { %818 = vrot.lane.b32.xlu2 %v634_v22, %s2430_s9 }
 0x2d4   :  { %v2794_v0 = vpop.f32.mrf.mxu3 }
 0x2d5   :  { %v635_v62 = vadd.f32 %v626_v48, %v2794_v0  ;;  %v622_v43 = vadd.f32 %v2309_v23, %v2794_v0 }
 0x2d7   :  { %846 = vrot.lane.b32.xlu1 %v635_v62, %s2430_s9 }
 0x313   :  { %v651_v31 = vpop.permute.xlu0 %650 }
 0x314   :  { %2205 = vmatpush.xpose.msk.msra.mxu3 %vm124_vm1, %v651_v31  ;;  %v735_v30 = vpop.permute.xlu2 %734 }
 0x317   :  { %2206 = vmatmul.msk.f32.vlgmr.msra.gmra.mxu3 %vm124_vm1, %v615_v24 }
 0x31c   :  { %v679_v25 = vpop.permute.xlu1 %678 }
 0x31d   :  { %2207 = vmatpush.xpose.msk.msrb.mxu3 %vm124_vm1, %v679_v25 }
 0x320   :  { %2208 = vmatmul.msk.f32.vlgmr.msrb.gmra.mxu3 %vm124_vm1, %v616_v20 }
 0x324   :  { %v707_v28 = vpop.permute.xlu0 %706 }
 0x325   :  { %2209 = vmatpush.xpose.msk.msra.mxu3 %vm124_vm1, %v707_v28 }
 0x328   :  { %2210 = vmatmul.msk.f32.vlgmr.msra.gmra.mxu3 %vm124_vm1, %v617_v9 }
 0x329   :  { %2211 = vmatpush.xpose.msk.msrb.mxu3 %vm124_vm1, %v735_v30 }
 0x32c   :  { %v819_v34 = vpop.permute.xlu2 %818 }
 0x330   :  { %2212 = vmatmul.msk.f32.vlgmr.msrb.gmra.mxu3 %vm124_vm1, %v618_v32 }
 0x334   :  { %v763_v35 = vpop.permute.xlu1 %762 }
 0x335   :  { %2213 = vmatpush.xpose.msk.msra.mxu2 %vm124_vm1, %v763_v35 }
 0x338   :  { %2214 = vmatmul.msk.f32.vlgmr.msra.gmra.mxu2 %vm124_vm1, %v619_v39 }
 0x339   :  { %2217 = vmatpush.xpose.msk.msrb.mxu2 %vm124_vm1, %v819_v34 }
 0x33c   :  { %v791_v29 = vpop.permute.xlu0 %790 }
 0x33d   :  { %2215 = vmatpush.xpose.msk.msra.mxu3 %vm124_vm1, %v791_v29 }
 0x340   :  { %2216 = vmatmul.msk.f32.vlgmr.msra.gmra.mxu3 %vm124_vm1, %v620_v40  ;;  %2218 = vmatmul.msk.f32.vlgmr.msrb.gmra.mxu2 %vm124_vm1, %v621_v16 }
 0x349   :  { %v847_v36 = vpop.permute.xlu1 %846 }
 0x34a   :  { %2219 = vmatpush.xpose.msk.msrb.mxu3 %vm124_vm1, %v847_v36 }
 0x34d   :  { %2220 = vmatmul.msk.f32.vlgmr.msrb.gmra.mxu3 %vm124_vm1, %v622_v43 }
 0x39a   :  { %v674_v44 = vpop.f32.mrf.mxu3 }
 0x39b   :  { %v873_v38 = vmul.f32 0.5, %v674_v44 }
 0x39d   :  { %v882_v26 = vsel %vm881_vm4, %v873_v38, -inf }
 0x39e   :  { %883 = vmax.xlane.f32.xlu0 %v882_v26 }
 0x3a3   :  { %v702_v42 = vpop.f32.mrf.mxu3 }
 0x3a4   :  { %v2825_v46 = vmul.f32 0.5, %v702_v42 }
 0x3a6   :  { %v885_v50 = vsel %vm881_vm4, %v2825_v46, -inf }
 0x3a7   :  { %886 = vmax.xlane.f32.xlu2 %v885_v50 }
 0x3ab   :  { %v730_v51 = vpop.f32.mrf.mxu3 }
 0x3ac   :  { %v875_v52 = vmul.f32 0.5, %v730_v51 }
 0x3ae   :  { %v888_v53 = vsel %vm881_vm4, %v875_v52, -inf }
 0x3af   :  { %889 = vmax.xlane.f32.xlu1 %v888_v53 }
 0x3b3   :  { %v758_v56 = vpop.f32.mrf.mxu3 }
 0x3b4   :  { %v2830_v59 = vmul.f32 0.5, %v758_v56 }
 0x3b6   :  { %v891_v61 = vsel %vm881_vm4, %v2830_v59, -inf }
 0x3b7   :  { %892 = vmax.xlane.f32.xlu0 %v891_v61 }
 0x3bb   :  { %v786_v57 = vpop.f32.mrf.mxu2 }
 0x3bc   :  { %v2837_v3 = vmul.f32 0.5, %v786_v57 }
 0x3be   :  { %v894_v4 = vsel %vm881_vm4, %v2837_v3, -inf }
 0x3bf   :  { %895 = vmax.xlane.f32.xlu1 %v894_v4  ;;  %638 = vrot.lane.b32.xlu2 %v2310_v27, %s2431_s14 }
 0x3c3   :  { %v814_v48 = vpop.f32.mrf.mxu3  ;;  %v842_v47 = vpop.f32.mrf.mxu2 }
 0x3c4   :  { %v878_v13 = vmul.f32 0.5, %v814_v48  ;;  %v879_v18 = vmul.f32 0.5, %v842_v47 }
 0x3c6   :  { %v900_v55 = vsel %vm881_vm4, %v879_v18, -inf  ;;  %v897_v11 = vsel %vm881_vm4, %v878_v13, -inf }
 0x3c7   :  { %901 = vmax.xlane.f32.xlu1 %v900_v55  ;;  %898 = vmax.xlane.f32.xlu0 %v897_v11 }
 0x3d0   :  { %v870_v21 = vpop.f32.mrf.mxu3 }
 0x3d1   :  { %v880_v22 = vmul.f32 0.5, %v870_v21 }
 0x3d3   :  { %v903_v62 = vsel %vm881_vm4, %v880_v22, -inf }
 0x3d4   :  { %904 = vmax.xlane.f32.xlu1 %v903_v62 }
 0x41a   :  { %v887_v23 = vpop.xlane.xlu2 %886 }
 0x41b   :  { %v907_v56 = vsub.f32 %v2825_v46, %v887_v23 }
 0x41d   :  { %v916_v57 = vmul.f32 1.442695, %v907_v56 }
 0x422   :  { %v2844_v31 = vpop.permute.xlu2 %638  ;;  %v890_v24 = vpop.xlane.xlu1 %889 }
 0x423   :  { %v908_v25 = vsub.f32 %v875_v52, %v890_v24  ;;  %v643_v20 = vadd.f32 %v2844_v31, %v2779_v7  ;;  %v644_v28 = vadd.f32 %v2844_v31, %v2782_v8  ;;  %v641_v30 = vadd.f32 %v2844_v31, %v2773_v5  ;;  %v884_v7 = vpop.xlane.xlu0 %883 }
 0x424   :  { %v642_v9 = vadd.f32 %v2844_v31, %v2776_v2  ;;  %v906_v43 = vsub.f32 %v873_v38, %v884_v7 }
 0x425   :  { %v918_v32 = vmul.f32 1.442695, %v908_v25  ;;  %v2279_v35 = vpack.i.bf16 %v644_v28, %v643_v20  ;;  %v645_v25 = vadd.f32 %v2844_v31, %v2785_v15  ;;  %v646_v20 = vadd.f32 %v2844_v31, %v2788_v17 }
 0x426   :  { %v2274_v34 = vpack.i.bf16 %v642_v9, %v641_v30  ;;  %v914_v26 = vmul.f32 1.442695, %v906_v43  ;;  %v648_v28 = vadd.f32 %v2844_v31, %v2794_v0 }
 0x427   :  { %2354 = vpow2.f32 %v918_v32  ;;  %2280 = vrot.lane.b32.xlu0 %v2279_v35, %s2432_s15 }
 0x428   :  { %2275 = vrot.lane.b32.xlu1 %v2274_v34, %s2432_s15 }
 0x42b   :  { %v893_v29 = vpop.xlane.xlu0 %892 }
 0x42c   :  { %v909_v4 = vsub.f32 %v2830_v59, %v893_v29 }
 0x42d   :  { %v2856_v39 = vpop.eup %2354 }
 0x42e   :  { %v936_v8 = vsel %vm881_vm4, %v2856_v39, 0.0 }
 0x42f   :  { %937 = vadd.xlane.f32.xlu2 %v936_v8 }
 0x432   :  { %v896_v5 = vpop.xlane.xlu1 %895 }
 0x433   :  { %v910_v59 = vsub.f32 %v2837_v3, %v896_v5  ;;  %v647_v3 = vadd.f32 %v2844_v31, %v2791_v19 }
 0x435   :  { %v922_v21 = vmul.f32 1.442695, %v910_v59 }
 0x43a   :  { %v902_v40 = vpop.xlane.xlu1 %901  ;;  %v899_v36 = vpop.xlane.xlu0 %898 }
 0x43b   :  { %v912_v2 = vsub.f32 %v879_v18, %v902_v40  ;;  %v911_v44 = vsub.f32 %v878_v13, %v899_v36  ;;  %v920_v18 = vmul.f32 1.442695, %v909_v4 }
 0x43d   :  { %v926_v16 = vmul.f32 1.442695, %v912_v2  ;;  %v924_v42 = vmul.f32 1.442695, %v911_v44 }
 0x43f   :  { %2356 = vpow2.f32 %v926_v16 }
 0x440   :  { %2358 = vpow2.f32 %v914_v26 }
 0x441   :  { %2360 = vpow2.f32 %v924_v42 }
 0x445   :  { %v2860_v50 = vpop.eup %2356 }
 0x446   :  { %v948_v52 = vsel %vm881_vm4, %v2860_v50, 0.0  ;;  %v2865_v38 = vpop.eup %2358 }
 0x447   :  { %v905_v51 = vpop.xlane.xlu1 %904  ;;  %949 = vadd.xlane.f32.xlu2 %v948_v52  ;;  %v2867_v27 = vpop.eup %2360  ;;  %v930_v47 = vsel %vm881_vm4, %v2865_v38, 0.0 }
 0x448   :  { %v913_v53 = vsub.f32 %v880_v22, %v905_v51  ;;  %v945_v46 = vsel %vm881_vm4, %v2867_v27, 0.0 }
 0x44a   :  { %v928_v61 = vmul.f32 1.442695, %v913_v53 }
 0x44c   :  { %2362 = vpow2.f32 %v928_v61 }
 0x44d   :  { %2364 = vpow2.f32 %v916_v57 }
 0x44e   :  { %2366 = vpow2.f32 %v920_v18 }
 0x44f   :  { %2368 = vpow2.f32 %v922_v21 }
 0x451   :  { %931 = vadd.xlane.f32.xlu0 %v930_v47 }
 0x452   :  { %v2870_v48 = vpop.eup %2362  ;;  %946 = vadd.xlane.f32.xlu1 %v945_v46 }
 0x453   :  { %v951_v13 = vsel %vm881_vm4, %v2870_v48, 0.0  ;;  %v2878_v55 = vpop.eup %2364 }
 0x454   :  { %952 = vadd.xlane.f32.xlu2 %v951_v13  ;;  %v933_v11 = vsel %vm881_vm4, %v2878_v55, 0.0  ;;  %v2883_v22 = vpop.eup %2366 }
 0x455   :  { %v939_v62 = vsel %vm881_vm4, %v2883_v22, 0.0  ;;  %v2887_v23 = vpop.eup %2368 }
 0x456   :  { %v942_v24 = vsel %vm881_vm4, %v2887_v23, 0.0 }
 0x459   :  { %934 = vadd.xlane.f32.xlu0 %v933_v11 }
 0x461   :  { %940 = vadd.xlane.f32.xlu0 %v939_v62 }
 0x469   :  { %943 = vadd.xlane.f32.xlu0 %v942_v24 }
 0x46c   :  { %1237 = vrot.lane.b32.xlu2 %v647_v3, %s2432_s15 }
 0x47d   :  { %1183 = vrot.lane.b32.xlu0 %v645_v25, %s2432_s15 }
 0x485   :  { %1210 = vrot.lane.b32.xlu0 %v646_v20, %s2432_s15 }
 0x48d   :  { %1264 = vrot.lane.b32.xlu0 %v648_v28, %s2432_s15 }
 0x495   :  { %1290 = vrot.lane.b32.xlu0 %v2609_v10, %s2433_s16 }
 0x499   :  { %v2281_v19 = vpop.permute.xlu0 %2280 }
 0x49a   :  { %v2276_v30 = vpop.permute.xlu1 %2275  ;;  %v2283_v9 = vunpack.i.h.bf16 %v2281_v19  ;;  %v2282_v32 = vunpack.i.l.bf16 %v2281_v19 }
 0x49b   :  { %v2278_v15 = vunpack.i.h.bf16 %v2276_v30  ;;  %v2277_v35 = vunpack.i.l.bf16 %v2276_v30 }
 0x49d   :  { %1096 = vmatpush.msra.mxu2 %v2277_v35  ;;  %1123 = vmatpush.msra.mxu3 %v2278_v15 }
 0x49f   :  { %1150 = vmatpush.msrb.mxu2 %v2282_v32  ;;  %1177 = vmatpush.msrb.mxu3 %v2283_v9 }
 0x4a2   :  { %v938_v17 = vpop.xlane.xlu2 %937 }
 0x4a3   :  { %2370 = vrcp.f32 %v938_v17  ;;  %v993_v4 = vand.u32 2147483648, %v938_v17  ;;  %vm987_vm10 = vweird.f32 %v938_v17  ;;  %v991_v46 = vand.u32 2147483647, %v938_v17 }
 0x4a5   :  { %v994_v24 = vor.u32 1.1754944e-38, %v993_v4  ;;  %vm992_vm14 = vcmp.eq.f32.partialorder %v991_v46, 8.507059e+37 }
 0x4a9   :  { %v2371_v0 = vpop.eup %2370 }
 0x4aa   :  { %v983_v31 = vmul.f32 %v2371_v0, %v938_v17  ;;  %vm988_vm9 = vweird.f32 %v2371_v0 }
 0x4ab   :  { %vm2910_vm11 = vmor %vm987_vm10, %vm988_vm9 }
 0x4ac   :  { %v984_v10 = vsub.f32 1.0, %v983_v31 }
 0x4ae   :  { %v985_v36 = vmul.f32 %v2371_v0, %v984_v10 }
 0x4b0   :  { %v986_v56 = vadd.f32 %v2371_v0, %v985_v36 }
 0x4b2   :  { %v990_v62 = vsel %vm2910_vm11, %v2371_v0, %v986_v56 }
 0x4b3   :  { %v995_v28 = vsel %vm992_vm14, %v994_v24, %v990_v62 }
 0x4ba   :  { %v2904_v26 = vpop.xlane.xlu2 %949 }
 0x4bb   :  { %vm1043_vm14 = vweird.f32 %v2904_v26  ;;  %v1049_v62 = vand.u32 2147483648, %v2904_v26 }
 0x4c4   :  { %v932_v34 = vpop.xlane.xlu0 %931 }
 0x4c5   :  { %2372 = vrcp.f32 %v932_v34  ;;  %v965_v40 = vand.u32 2147483648, %v932_v34  ;;  %v963_v16 = vand.u32 2147483647, %v932_v34  ;;  %vm959_vm6 = vweird.f32 %v932_v34  ;;  %v2906_v61 = vpop.xlane.xlu1 %946 }
 0x4c6   :  { %v1035_v24 = vand.u32 2147483648, %v2906_v61 }
 0x4c7   :  { %v966_v42 = vor.u32 1.1754944e-38, %v965_v40  ;;  %vm964_vm8 = vcmp.eq.f32.partialorder %v963_v16, 8.507059e+37  ;;  %v2920_v32 = vpop.xlane.xlu2 %952 }
 0x4cb   :  { %v2373_v7 = vpop.eup %2372 }
 0x4cc   :  { %v955_v8 = vmul.f32 %v2373_v7, %v932_v34  ;;  %v935_v5 = vpop.xlane.xlu0 %934  ;;  %vm960_vm5 = vweird.f32 %v2373_v7 }
 0x4cd   :  { %2374 = vrcp.f32 %v935_v5  ;;  %vm961_vm7 = vmor %vm959_vm6, %vm960_vm5  ;;  %v979_v13 = vand.u32 2147483648, %v935_v5  ;;  %v977_v21 = vand.u32 2147483647, %v935_v5  ;;  %vm973_vm13 = vweird.f32 %v935_v5 }
 0x4ce   :  { %v956_v29 = vsub.f32 1.0, %v955_v8 }
 0x4cf   :  { %vm978_vm2 = vcmp.eq.f32.partialorder %v977_v21, 8.507059e+37 }
 0x4d0   :  { %v957_v2 = vmul.f32 %v2373_v7, %v956_v29 }
 0x4d2   :  { %v958_v43 = vadd.f32 %v2373_v7, %v957_v2 }
 0x4d3   :  { %v2375_v44 = vpop.eup %2374 }
 0x4d4   :  { %v962_v51 = vsel %vm961_vm7, %v2373_v7, %v958_v43  ;;  %v969_v52 = vmul.f32 %v2375_v44, %v935_v5  ;;  %v941_v53 = vpop.xlane.xlu0 %940  ;;  %vm974_vm12 = vweird.f32 %v2375_v44  ;;  %v1068_v7 = vmul.f32 %v2856_v39, %v995_v28 }
 0x4d5   :  { %v967_v57 = vsel %vm964_vm8, %v966_v42, %v962_v51  ;;  %2376 = vrcp.f32 %v941_v53  ;;  %vm975_vm15 = vmor %vm973_vm13, %vm974_vm12  ;;  %v1007_v31 = vand.u32 2147483648, %v941_v53  ;;  %v1005_v5 = vand.u32 2147483647, %v941_v53 }
 0x4d6   :  { %2378 = vrcp.f32 %v2904_v26  ;;  %v970_v47 = vsub.f32 1.0, %v969_v52  ;;  %v1066_v18 = vmul.f32 %v2865_v38, %v967_v57  ;;  %v980_v38 = vor.u32 1.1754944e-38, %v979_v13 }
 0x4d7   :  { %2380 = vrcp.f32 %v2906_v61  ;;  %vm1001_vm5 = vweird.f32 %v941_v53  ;;  %v1008_v40 = vor.u32 1.1754944e-38, %v1007_v31  ;;  %vm1006_vm7 = vcmp.eq.f32.partialorder %v1005_v5, 8.507059e+37 }
 0x4d8   :  { %v971_v11 = vmul.f32 %v2375_v44, %v970_v47  ;;  %2221 = vmatmul.msk.f32.vlgmr.msra.gmra.mxu2 %vm881_vm4, %v1066_v18  ;;  %v1033_v28 = vand.u32 2147483647, %v2906_v61 }
 0x4da   :  { %v972_v3 = vadd.f32 %v2375_v44, %v971_v11 }
 0x4db   :  { %v2377_v25 = vpop.eup %2376 }
 0x4dc   :  { %v2918_v20 = vpop.eup %2378  ;;  %v976_v19 = vsel %vm975_vm15, %v2375_v44, %v972_v3  ;;  %v997_v30 = vmul.f32 %v2377_v25, %v941_v53  ;;  %v944_v9 = vpop.xlane.xlu0 %943  ;;  %vm1002_vm3 = vweird.f32 %v2377_v25 }
 0x4dd   :  { %v981_v15 = vsel %vm978_vm2, %v980_v38, %v976_v19  ;;  %2382 = vrcp.f32 %v944_v9  ;;  %v2922_v35 = vpop.eup %2380  ;;  %v1039_v0 = vmul.f32 %v2918_v20, %v2904_v26  ;;  %vm1003_vm6 = vmor %vm1001_vm5, %vm1002_vm3  ;;  %v1021_v52 = vand.u32 2147483648, %v944_v9 }
 0x4de   :  { %v998_v17 = vsub.f32 1.0, %v997_v30  ;;  %v1067_v34 = vmul.f32 %v2878_v55, %v981_v15  ;;  %2384 = vrcp.f32 %v2920_v32  ;;  %v1025_v10 = vmul.f32 %v2922_v35, %v2906_v61  ;;  %v1238_v15 = vpop.permute.xlu2 %1237 }
 0x4df   :  { %v1040_v2 = vsub.f32 1.0, %v1039_v0  ;;  %v1019_v53 = vand.u32 2147483647, %v944_v9  ;;  %vm1015_vm9 = vweird.f32 %v944_v9  ;;  %v1022_v13 = vor.u32 1.1754944e-38, %v1021_v52 }
 0x4e0   :  { %v999_v8 = vmul.f32 %v2377_v25, %v998_v17  ;;  %2222 = vmatmul.msk.f32.vlgmr.msra.gmra.mxu3 %vm881_vm4, %v1067_v34  ;;  %2223 = vmatmul.msk.f32.vlgmr.msrb.gmra.mxu2 %vm881_vm4, %v1068_v7  ;;  %v1026_v36 = vsub.f32 1.0, %v1025_v10  ;;  %vm1044_vm11 = vweird.f32 %v2918_v20  ;;  %vm1030_vm13 = vweird.f32 %v2922_v35 }
 0x4e1   :  { %v1041_v56 = vmul.f32 %v2918_v20, %v1040_v2  ;;  %vm1020_vm12 = vcmp.eq.f32.partialorder %v1019_v53, 8.507059e+37  ;;  %vm2949_vm15 = vmor %vm1043_vm14, %vm1044_vm11  ;;  %v1047_v38 = vand.u32 2147483647, %v2904_v26  ;;  %vm1029_vm2 = vweird.f32 %v2906_v61 }
 0x4e2   :  { %v1000_v29 = vadd.f32 %v2377_v25, %v999_v8  ;;  %v1027_v4 = vmul.f32 %v2922_v35, %v1026_v36  ;;  %vm1031_vm3 = vmor %vm1029_vm2, %vm1030_vm13  ;;  %v1050_v17 = vor.u32 1.1754944e-38, %v1049_v62  ;;  %v1036_v26 = vor.u32 1.1754944e-38, %v1035_v24 }
 0x4e3   :  { %v2383_v55 = vpop.eup %2382  ;;  %v1042_v18 = vadd.f32 %v2918_v20, %v1041_v56  ;;  %vm1048_vm5 = vcmp.eq.f32.partialorder %v1047_v38, 8.507059e+37 }
 0x4e4   :  { %v1004_v16 = vsel %vm1003_vm6, %v2377_v25, %v1000_v29  ;;  %v1011_v39 = vmul.f32 %v2383_v55, %v944_v9  ;;  %v2933_v44 = vpop.eup %2384  ;;  %vm1016_vm8 = vweird.f32 %v2383_v55  ;;  %v1028_v59 = vadd.f32 %v2922_v35, %v1027_v4 }
 0x4e5   :  { %v1009_v43 = vsel %vm1006_vm7, %v1008_v40, %v1004_v16  ;;  %v1053_v47 = vmul.f32 %v2933_v44, %v2920_v32  ;;  %vm1017_vm10 = vmor %vm1015_vm9, %vm1016_vm8  ;;  %v1046_v30 = vsel %vm2949_vm15, %v2918_v20, %v1042_v18  ;;  %vm1034_vm6 = vcmp.eq.f32.partialorder %v1033_v28, 8.507059e+37 }
 0x4e6   :  { %v1012_v42 = vsub.f32 1.0, %v1011_v39  ;;  %v1069_v51 = vmul.f32 %v2883_v22, %v1009_v43  ;;  %v1032_v9 = vsel %vm1031_vm3, %v2922_v35, %v1028_v59  ;;  %v1051_v61 = vsel %vm1048_vm5, %v1050_v17, %v1046_v30 }
 0x4e7   :  { %v1054_v11 = vsub.f32 1.0, %v1053_v47  ;;  %v1037_v34 = vsel %vm1034_vm6, %v1036_v26, %v1032_v9  ;;  %vm1058_vm7 = vweird.f32 %v2933_v44  ;;  %v1063_v20 = vand.u32 2147483648, %v2920_v32 }
 0x4e8   :  { %v1013_v57 = vmul.f32 %v2383_v55, %v1012_v42  ;;  %2224 = vmatmul.msk.f32.vlgmr.msrb.gmra.mxu3 %vm881_vm4, %v1069_v51  ;;  %vm1057_vm8 = vweird.f32 %v2920_v32  ;;  %v1061_v35 = vand.u32 2147483647, %v2920_v32  ;;  %v1071_v7 = vmul.f32 %v2867_v27, %v1037_v34 }
 0x4e9   :  { %v1072_v8 = vmul.f32 %v2860_v50, %v1051_v61  ;;  %vm1059_vm9 = vmor %vm1057_vm8, %vm1058_vm7  ;;  %v1064_v10 = vor.u32 1.1754944e-38, %v1063_v20 }
 0x4ea   :  { %v1014_v46 = vadd.f32 %v2383_v55, %v1013_v57 }
 0x4ec   :  { %v1018_v22 = vsel %vm1017_vm10, %v2383_v55, %v1014_v46  ;;  %vm1062_vm10 = vcmp.eq.f32.partialorder %v1061_v35, 8.507059e+37 }
 0x4ed   :  { %v1023_v21 = vsel %vm1020_vm12, %v1022_v13, %v1018_v22 }
 0x4ee   :  { %v1070_v3 = vmul.f32 %v2887_v23, %v1023_v21  ;;  %v1055_v23 = vmul.f32 %v2933_v44, %v1054_v11 }
 0x4ef   :  { %v1184_v19 = vpop.permute.xlu0 %1183 }
 0x4f0   :  { %1204 = vmatpush.msra.mxu2 %v1184_v19  ;;  %v1056_v0 = vadd.f32 %v2933_v44, %v1055_v23 }
 0x4f1   :  { %2225 = vmatmul.msk.f32.vlgmr.msra.gmra.mxu2 %vm881_vm4, %v1070_v3 }
 0x4f2   :  { %1258 = vmatpush.msrb.mxu2 %v1238_v15  ;;  %v1060_v5 = vsel %vm1059_vm9, %v2933_v44, %v1056_v0  ;;  %v2311_v44 = vld [vmem:[%s3287_s5 + $0x3] ss:$0 sm:$0xff] }
 0x4f3   :  { %v1065_v29 = vsel %vm1062_vm10, %v1064_v10, %v1060_v5 }
 0x4f4   :  { %v1073_v40 = vmul.f32 %v2870_v48, %v1065_v29 }
 0x4f7   :  { %v1211_v31 = vpop.permute.xlu0 %1210 }
 0x4f8   :  { %1231 = vmatpush.msra.mxu3 %v1211_v31 }
 0x4f9   :  { %2226 = vmatmul.msk.f32.vlgmr.msra.gmra.mxu3 %vm881_vm4, %v1071_v7  ;;  %2227 = vmatmul.msk.f32.vlgmr.msrb.gmra.mxu2 %vm881_vm4, %v1072_v8  ;;  %v2434_v8 = vmov 0  }
 0x4fa   :  { %2284 = vset.pattern.permute.xlu2 %v2434_v8 }
 0x4ff   :  { %v1265_v55 = vpop.permute.xlu0 %1264 }
 0x500   :  { %1285 = vmatpush.msrb.mxu3 %v1265_v55 }
 0x501   :  { %2228 = vmatmul.msk.f32.vlgmr.msrb.gmra.mxu3 %vm881_vm4, %v1073_v40 }
 0x507   :  { %v1291_v27 = vpop.permute.xlu0 %1290 }
 0x508   :  { %2229 = vmatpush.msk.msrb.mxu0 %vm149_vm0, %v1291_v27 }
 0x55b   :  { %v1098_v50 = vpop.f32.mrf.mxu2 }
 0x55c   :  { %2230 = vmatmul.msk.f32.vlgmr.msrb.gmra.mxu0 %vm124_vm1, %v1098_v50 }
 0x563   :  { %v1125_v32 = vpop.f32.mrf.mxu3  ;;  %v1152_v2 = vpop.f32.mrf.mxu2 }
 0x564   :  { %2231 = vmatmul.msk.f32.gmra.mxu0 %vm124_vm1, %v1125_v32 }
 0x56b   :  { %v1179_v16 = vpop.f32.mrf.mxu3 }
 0x56c   :  { %2232 = vmatmul.msk.f32.gmra.mxu0 %vm124_vm1, %v1152_v2 }
 0x574   :  { %2233 = vmatmul.msk.f32.gmra.mxu0 %vm124_vm1, %v1179_v16  ;;  %v1206_v39 = vpop.f32.mrf.mxu2 }
 0x57c   :  { %2234 = vmatmul.msk.f32.gmra.mxu0 %vm124_vm1, %v1206_v39  ;;  %v1233_v48 = vpop.f32.mrf.mxu3  ;;  %v1260_v36 = vpop.f32.mrf.mxu2 }
 0x584   :  { %2235 = vmatmul.msk.f32.gmra.mxu0 %vm124_vm1, %v1233_v48  ;;  %v1287_v43 = vpop.f32.mrf.mxu3 }
 0x58c   :  { %2236 = vmatmul.msk.f32.gmra.mxu0 %vm124_vm1, %v1260_v36 }
 0x594   :  { %2237 = vmatmul.msk.f32.gmra.mxu0 %vm124_vm1, %v1287_v43 }
 0x5d9   :  { %v1335_v42 = vpop.f32.mrf.mxu0 }
 0x5da   :  { %v1359_v51 = vadd.f32 %v1335_v42, %v2512_v33 }
 0x5dc   :  { %v2987_v52 = vadd.f32 %v2311_v44, %v1359_v51 }
 0x5de   :  { %v1376_v56 = vsel %vm124_vm1, %v2987_v52, 0.0 }
 0x5df   :  { %1377 = vadd.xlane.f32.xlu1 %v1376_v56 }
 0x5e1   :  { %v1338_v57 = vpop.f32.mrf.mxu0 }
 0x5e2   :  { %v1360_v53 = vadd.f32 %v1338_v57, %v2516_v37 }
 0x5e4   :  { %v2992_v4 = vadd.f32 %v2311_v44, %v1360_v53  ;;  %v1857_v53 = vld [vmem:[%s3289_s1] sm:$0xff] }
 0x5e6   :  { %v1379_v47 = vsel %vm124_vm1, %v2992_v4, 0.0 }
 0x5e7   :  { %1380 = vadd.xlane.f32.xlu0 %v1379_v47  ;;  %v2255_v47 = vadd.s32 4294967295, %v1857_v53 }
 0x5e9   :  { %v1341_v46 = vpop.f32.mrf.mxu0  ;;  %vm1859_vm11 = vcmp.gt.s32.totalorder %v2255_v47, 0 }
 0x5ea   :  { %v1361_v13 = vadd.f32 %v1341_v46, %v2520_v41  ;;  %v1860_v46 = vsel %vm1859_vm11, %v2255_v47, 0 }
 0x5ec   :  { %v2997_v18 = vadd.f32 %v2311_v44, %v1361_v13 }
 0x5ee   :  { %v1382_v33 = vsel %vm124_vm1, %v2997_v18, 0.0 }
 0x5ef   :  { %1383 = vadd.xlane.f32.xlu1 %v1382_v33 }
 0x5f1   :  { %v1344_v22 = vpop.f32.mrf.mxu0 }
 0x5f2   :  { %v1362_v59 = vadd.f32 %v1344_v22, %v2524_v45 }
 0x5f4   :  { %v3002_v11 = vadd.f32 %v2311_v44, %v1362_v59 }
 0x5f6   :  { %v1385_v37 = vsel %vm124_vm1, %v3002_v11, 0.0 }
 0x5f7   :  { %1386 = vadd.xlane.f32.xlu2 %v1385_v37 }
 0x5f9   :  { %v1347_v21 = vpop.f32.mrf.mxu0 }
 0x5fa   :  { %v1363_v62 = vadd.f32 %v1347_v21, %v2528_v49 }
 0x5fc   :  { %v3007_v24 = vadd.f32 %v2311_v44, %v1363_v62 }
 0x5fe   :  { %v1388_v41 = vsel %vm124_vm1, %v3007_v24, 0.0 }
 0x5ff   :  { %1389 = vadd.xlane.f32.xlu1 %v1388_v41 }
 0x601   :  { %v1350_v3 = vpop.f32.mrf.mxu0 }
 0x602   :  { %v1364_v25 = vadd.f32 %v1350_v3, %v2532_v54 }
 0x604   :  { %v3012_v38 = vadd.f32 %v2311_v44, %v1364_v25 }
 0x606   :  { %v1391_v45 = vsel %vm124_vm1, %v3012_v38, 0.0 }
 0x607   :  { %1392 = vadd.xlane.f32.xlu1 %v1391_v45 }
 0x609   :  { %v1353_v30 = vpop.f32.mrf.mxu0 }
 0x60a   :  { %v1365_v23 = vadd.f32 %v1353_v30, %v2538_v60 }
 0x60c   :  { %v3025_v26 = vadd.f32 %v2311_v44, %v1365_v23 }
 0x60e   :  { %v1394_v60 = vsel %vm124_vm1, %v3025_v26, 0.0 }
 0x611   :  { %v1356_v34 = vpop.f32.mrf.mxu0 }
 0x612   :  { %v1366_v20 = vadd.f32 %v1356_v34, %v2536_v58 }
 0x614   :  { %v3037_v5 = vadd.f32 %v2311_v44, %v1366_v20 }
 0x616   :  { %v1397_v55 = vsel %vm124_vm1, %v3037_v5, 0.0 }
 0x652   :  { %v1378_v28 = vpop.xlane.xlu1 %1377 }
 0x653   :  { %v1400_v19 = vmul.f32 %v1378_v28, %v2544_v6  ;;  %v37_v28 = vld [vmem:[%s3290_s4] sm:$0xf] }
 0x654   :  { %2238 = vmatpush.msk.msrb.mxu1 %vm149_vm0, %v37_v28 }
 0x655   :  { %v3018_v49 = vsub.f32 %v2987_v52, %v1400_v19 }
 0x657   :  { %v1416_v9 = vmul.f32 %v3018_v49, %v3018_v49 }
 0x659   :  { %v1424_v54 = vsel %vm124_vm1, %v1416_v9, 0.0 }
 0x65a   :  { %v1381_v15 = vpop.xlane.xlu0 %1380  ;;  %1425 = vadd.xlane.f32.xlu1 %v1424_v54 }
 0x65b   :  { %v1401_v17 = vmul.f32 %v1381_v15, %v2544_v6 }
 0x65d   :  { %v3028_v61 = vsub.f32 %v2992_v4, %v1401_v17 }
 0x65f   :  { %v1417_v0 = vmul.f32 %v3028_v61, %v3028_v61 }
 0x661   :  { %v1427_v35 = vsel %vm124_vm1, %v1417_v0, 0.0 }
 0x662   :  { %1428 = vadd.xlane.f32.xlu0 %v1427_v35  ;;  %v1384_v31 = vpop.xlane.xlu1 %1383  ;;  %1395 = vadd.xlane.f32.xlu1 %v1394_v60 }
 0x663   :  { %v1402_v7 = vmul.f32 %v1384_v31, %v2544_v6 }
 0x665   :  { %v3040_v10 = vsub.f32 %v2997_v18, %v1402_v7 }
 0x667   :  { %v1418_v58 = vmul.f32 %v3040_v10, %v3040_v10 }
 0x669   :  { %v1430_v29 = vsel %vm124_vm1, %v1418_v58, 0.0 }
 0x66a   :  { %1431 = vadd.xlane.f32.xlu2 %v1430_v29  ;;  %v1387_v40 = vpop.xlane.xlu2 %1386  ;;  %1398 = vadd.xlane.f32.xlu1 %v1397_v55 }
 0x66b   :  { %v1403_v27 = vmul.f32 %v1387_v40, %v2544_v6 }
 0x66d   :  { %v3049_v50 = vsub.f32 %v3002_v11, %v1403_v27 }
 0x66f   :  { %v1419_v32 = vmul.f32 %v3049_v50, %v3049_v50 }
 0x671   :  { %v1433_v2 = vsel %vm124_vm1, %v1419_v32, 0.0 }
 0x672   :  { %1434 = vadd.xlane.f32.xlu0 %v1433_v2  ;;  %v1390_v16 = vpop.xlane.xlu1 %1389 }
 0x673   :  { %v1404_v39 = vmul.f32 %v1390_v16, %v2544_v6 }
 0x675   :  { %v3056_v48 = vsub.f32 %v3007_v24, %v1404_v39 }
 0x677   :  { %v1420_v36 = vmul.f32 %v3056_v48, %v3056_v48 }
 0x679   :  { %v1436_v43 = vsel %vm124_vm1, %v1420_v36, 0.0 }
 0x67a   :  { %v1393_v44 = vpop.xlane.xlu1 %1392  ;;  %1437 = vadd.xlane.f32.xlu1 %v1436_v43 }
 0x67b   :  { %v1405_v42 = vmul.f32 %v1393_v44, %v2544_v6 }
 0x67d   :  { %v3063_v51 = vsub.f32 %v3012_v38, %v1405_v42 }
 0x67f   :  { %v1421_v56 = vmul.f32 %v3063_v51, %v3063_v51 }
 0x681   :  { %v1439_v57 = vsel %vm124_vm1, %v1421_v56, 0.0 }
 0x682   :  { %1440 = vadd.xlane.f32.xlu2 %v1439_v57 }
 0x69a   :  { %1862 = vperm.xlu2 %2284, %v1860_v46  }
 0x6a2   :  { %2300 = vset.pattern.permute.xlu2 %v2470_v1 }
 0x6cd   :  { %v1426_v13 = vpop.xlane.xlu1 %1425 }
 0x6ce   :  { %v1448_v33 = vmul.f32 %v1426_v13, %v2602_v63 }
 0x6d0   :  { %2386 = vrsqrt.f32 %v1448_v33  ;;  %vm1472_vm12 = vcmp.eq.f32.partialorder %v1448_v33, inf  ;;  %v1475_v31 = vand.u32 2147483648, %v1448_v33  ;;  %vm1474_vm13 = vcmp.eq.f32.partialorder %v1448_v33, 0.0 }
 0x6d5   :  { %v1429_v22 = vpop.xlane.xlu0 %1428  ;;  %v1396_v59 = vpop.xlane.xlu1 %1395 }
 0x6d6   :  { %v2387_v37 = vpop.eup %2386  ;;  %v1449_v21 = vmul.f32 %v1429_v22, %v2602_v63  ;;  %v1406_v62 = vmul.f32 %v1396_v59, %v2544_v6 }
 0x6d7   :  { %v1466_v41 = vmul.f32 %v2387_v37, %v1448_v33 }
 0x6d8   :  { %2388 = vrsqrt.f32 %v1449_v21  ;;  %v3076_v3 = vsub.f32 %v3025_v26, %v1406_v62  ;;  %vm1484_vm14 = vcmp.eq.f32.partialorder %v1449_v21, inf  ;;  %v1487_v42 = vand.u32 2147483648, %v1449_v21 }
 0x6d9   :  { %v1467_v25 = vmul.f32 %v2387_v37, %v1466_v41  ;;  %vm1486_vm15 = vcmp.eq.f32.partialorder %v1449_v21, 0.0 }
 0x6da   :  { %v1422_v1 = vmul.f32 %v3076_v3, %v3076_v3 }
 0x6db   :  { %v1468_v45 = vmul.f32 0.5, %v1467_v25 }
 0x6dc   :  { %v1442_v19 = vsel %vm124_vm1, %v1422_v1, 0.0 }
 0x6dd   :  { %v1469_v30 = vsub.f32 1.5, %v1468_v45  ;;  %v1432_v9 = vpop.xlane.xlu2 %1431  ;;  %1443 = vadd.xlane.f32.xlu0 %v1442_v19  ;;  %v1399_v23 = vpop.xlane.xlu1 %1398 }
 0x6de   :  { %v2389_v54 = vpop.eup %2388  ;;  %v1450_v15 = vmul.f32 %v1432_v9, %v2602_v63  ;;  %v1407_v17 = vmul.f32 %v1399_v23, %v2544_v6 }
 0x6df   :  { %v1470_v34 = vmul.f32 %v2387_v37, %v1469_v30  ;;  %v1478_v0 = vmul.f32 %v2389_v54, %v1449_v21 }
 0x6e0   :  { %2390 = vrsqrt.f32 %v1450_v15  ;;  %v3088_v20 = vsub.f32 %v3037_v5, %v1407_v17  ;;  %vm1496_vm2 = vcmp.eq.f32.partialorder %v1450_v15, inf  ;;  %v1499_v19 = vand.u32 2147483648, %v1450_v15 }
 0x6e1   :  { %v1471_v35 = vmul.f32 %v1470_v34, %v1448_v33  ;;  %v1479_v60 = vmul.f32 %v2389_v54, %v1478_v0  ;;  %vm1498_vm5 = vcmp.eq.f32.partialorder %v1450_v15, 0.0 }
 0x6e2   :  { %v1423_v7 = vmul.f32 %v3088_v20, %v3088_v20 }
 0x6e3   :  { %v1473_v8 = vsel %vm1472_vm12, %v1448_v33, %v1471_v35  ;;  %v1480_v58 = vmul.f32 0.5, %v1479_v60 }
 0x6e4   :  { %v1445_v29 = vsel %vm124_vm1, %v1423_v7, 0.0  ;;  %v1476_v55 = vsel %vm1474_vm13, %v1475_v31, %v1473_v8 }
 0x6e5   :  { %v1481_v40 = vsub.f32 1.5, %v1480_v58  ;;  %v1435_v27 = vpop.xlane.xlu0 %1434  ;;  %1446 = vadd.xlane.f32.xlu1 %v1445_v29  ;;  %v1561_v32 = vadd.f32 1e-06, %v1476_v55 }
 0x6e6   :  { %v2391_v2 = vpop.eup %2390  ;;  %v3094_v16 = vmul.f32 %v1435_v27, %v2602_v63 }
 0x6e7   :  { %v1482_v39 = vmul.f32 %v2389_v54, %v1481_v40  ;;  %v1490_v36 = vmul.f32 %v2391_v2, %v1450_v15  ;;  %2392 = vrcp.f32 %v1561_v32  ;;  %v1580_v28 = vand.u32 2147483648, %v1561_v32 }
 0x6e8   :  { %2394 = vrsqrt.f32 %v3094_v16  ;;  %v1578_v9 = vand.u32 2147483647, %v1561_v32  ;;  %vm1574_vm6 = vweird.f32 %v1561_v32  ;;  %vm1508_vm9 = vcmp.eq.f32.partialorder %v3094_v16, inf }
 0x6e9   :  { %v1483_v43 = vmul.f32 %v1482_v39, %v1449_v21  ;;  %v1491_v44 = vmul.f32 %v2391_v2, %v1490_v36  ;;  %v1581_v7 = vor.u32 1.1754944e-38, %v1580_v28  ;;  %vm1510_vm10 = vcmp.eq.f32.partialorder %v3094_v16, 0.0 }
 0x6ea   :  { %vm1579_vm8 = vcmp.eq.f32.partialorder %v1578_v9, 8.507059e+37 }
 0x6eb   :  { %v1492_v56 = vmul.f32 0.5, %v1491_v44  ;;  %v1485_v57 = vsel %vm1484_vm14, %v1449_v21, %v1483_v43  ;;  %v3108_v21 = vld [vmem:[%s3287_s5 + $0x6] ss:$0 sm:$0xff] }
 0x6ec   :  { %v1488_v53 = vsel %vm1486_vm15, %v1487_v42, %v1485_v57  ;;  %v1457_v35 = vmul.f32 %v3108_v21, %v3018_v49  ;;  %v1511_v42 = vand.u32 2147483648, %v3094_v16 }
 0x6ed   :  { %v2393_v47 = vpop.eup %2392  ;;  %v1493_v46 = vsub.f32 1.5, %v1492_v56  ;;  %v1438_v13 = vpop.xlane.xlu1 %1437  ;;  %v3097_v33 = vadd.f32 1e-06, %v1488_v53 }
 0x6ee   :  { %v2395_v22 = vpop.eup %2394  ;;  %v3100_v59 = vmul.f32 %v1438_v13, %v2602_v63  ;;  %v1570_v37 = vmul.f32 %v2393_v47, %v1561_v32  ;;  %vm1575_vm3 = vweird.f32 %v2393_v47  ;;  %v1458_v13 = vmul.f32 %v3108_v21, %v3028_v61 }
 0x6ef   :  { %v1494_v62 = vmul.f32 %v2391_v2, %v1493_v46  ;;  %v1502_v41 = vmul.f32 %v2395_v22, %v3094_v16  ;;  %2396 = vrcp.f32 %v3097_v33  ;;  %vm1576_vm7 = vmor %vm1574_vm6, %vm1575_vm3  ;;  %v1593_v44 = vand.u32 2147483647, %v3097_v33 }
 0x6f0   :  { %2398 = vrsqrt.f32 %v3100_v59  ;;  %v1571_v25 = vsub.f32 1.0, %v1570_v37  ;;  %v1595_v57 = vand.u32 2147483648, %v3097_v33  ;;  %vm1520_vm12 = vcmp.eq.f32.partialorder %v3100_v59, inf }
 0x6f1   :  { %v1495_v1 = vmul.f32 %v1494_v62, %v1450_v15  ;;  %v1503_v45 = vmul.f32 %v2395_v22, %v1502_v41  ;;  %vm1589_vm13 = vweird.f32 %v3097_v33  ;;  %v1523_v41 = vand.u32 2147483648, %v3100_v59 }
 0x6f2   :  { %v1572_v30 = vmul.f32 %v2393_v47, %v1571_v25  ;;  %vm1594_vm14 = vcmp.eq.f32.partialorder %v1593_v44, 8.507059e+37  ;;  %v1596_v61 = vor.u32 1.1754944e-38, %v1595_v57 }
 0x6f3   :  { %v1504_v23 = vmul.f32 0.5, %v1503_v45  ;;  %v1497_v54 = vsel %vm1496_vm2, %v1450_v15, %v1495_v1  ;;  %v3120_v15 = vld [vmem:[%s3287_s5 + $0x7] ss:$0 sm:$0xff] }
 0x6f4   :  { %v1573_v17 = vadd.f32 %v2393_v47, %v1572_v30  ;;  %v1500_v34 = vsel %vm1498_vm5, %v1499_v19, %v1497_v54  ;;  %vm1522_vm5 = vcmp.eq.f32.partialorder %v3100_v59, 0.0 }
 0x6f5   :  { %v2397_v0 = vpop.eup %2396  ;;  %v1505_v60 = vsub.f32 1.5, %v1504_v23  ;;  %v1441_v31 = vpop.xlane.xlu2 %1440  ;;  %v3112_v8 = vadd.f32 1e-06, %v1500_v34 }
 0x6f6   :  { %v2399_v58 = vpop.eup %2398  ;;  %v3115_v29 = vmul.f32 %v1441_v31, %v2602_v63  ;;  %v1577_v55 = vsel %vm1576_vm7, %v2393_v47, %v1573_v17  ;;  %v1585_v40 = vmul.f32 %v2397_v0, %v3097_v33  ;;  %vm1590_vm11 = vweird.f32 %v2397_v0 }
 0x6f7   :  { %v1506_v49 = vmul.f32 %v2395_v22, %v1505_v60  ;;  %v1514_v27 = vmul.f32 %v2399_v58, %v3100_v59  ;;  %v1582_v32 = vsel %vm1579_vm8, %v1581_v7, %v1577_v55  ;;  %2400 = vrcp.f32 %v3112_v8  ;;  %vm1591_vm2 = vmor %vm1589_vm13, %vm1590_vm11 }
 0x6f8   :  { %2402 = vrsqrt.f32 %v3115_v29  ;;  %v1583_v2 = vmul.f32 %v1582_v32, %v1457_v35  ;;  %v1586_v43 = vsub.f32 1.0, %v1585_v40  ;;  %v1608_v55 = vand.u32 2147483647, %v3112_v8 }
 0x6f9   :  { %v1507_v39 = vmul.f32 %v1506_v49, %v3094_v16  ;;  %v1515_v36 = vmul.f32 %v2399_v58, %v1514_v27  ;;  %vm1604_vm6 = vweird.f32 %v3112_v8 }
 0x6fa   :  { %v1690_v56 = vadd.f32 %v3120_v15, %v1583_v2  ;;  %v1587_v47 = vmul.f32 %v2397_v0, %v1586_v43  ;;  %vm1609_vm8 = vcmp.eq.f32.partialorder %v1608_v55, 8.507059e+37 }
 0x6fb   :  { %v1516_v53 = vmul.f32 0.5, %v1515_v36  ;;  %v1509_v46 = vsel %vm1508_vm9, %v3094_v16, %v1507_v39  ;;  %vm1532_vm9 = vcmp.eq.f32.partialorder %v3115_v29, inf }
 0x6fc   :  { %2239 = vmatmul.msk.f32.vlgmr.msrb.gmra.mxu1 %vm124_vm1, %v1690_v56  ;;  %v1512_v22 = vsel %vm1510_vm10, %v1511_v42, %v1509_v46  ;;  %v1588_v1 = vadd.f32 %v2397_v0, %v1587_v47  ;;  %vm1534_vm10 = vcmp.eq.f32.partialorder %v3115_v29, 0.0 }
 0x6fd   :  { %v2401_v37 = vpop.eup %2400  ;;  %v1517_v62 = vsub.f32 1.5, %v1516_v53  ;;  %v1863_v25 = vpop.permute.xlu2 %1862  ;;  %v3143_v28 = vadd.f32 1e-06, %v1512_v22  ;;  %v1459_v53 = vmul.f32 %v3108_v21, %v3040_v10 }
 0x6fe   :  { %v2403_v45 = vpop.eup %2402  ;;  %vm1864_vm15 = vcmp.eq.s32.totalorder %v2483_v12, %v1863_v25  ;;  %v1600_v16 = vmul.f32 %v2401_v37, %v3112_v8  ;;  %v1592_v9 = vsel %vm1591_vm2, %v2397_v0, %v1588_v1  ;;  %vm1605_vm3 = vweird.f32 %v2401_v37 }
 0x6ff   :  { %v1518_v19 = vmul.f32 %v2399_v58, %v1517_v62  ;;  %v1526_v33 = vmul.f32 %v2403_v45, %v3115_v29  ;;  %v3147_v30 = vsel %vm1864_vm15, 1.0, %v2426_v14  ;;  %v1597_v23 = vsel %vm1594_vm14, %v1596_v61, %v1592_v9  ;;  %vm1606_vm7 = vmor %vm1604_vm6, %vm1605_vm3 }
 0x700   :  { %v1867_v54 = vperm.slane %v3147_v30, 0  ;;  %v1874_v17 = vperm.slane %v3147_v30, 1  ;;  %v1881_v12 = vperm.slane %v3147_v30, 2  ;;  %v1598_v60 = vmul.f32 %v1597_v23, %v1458_v13 }
 0x701   :  { %v1519_v34 = vmul.f32 %v1518_v19, %v3100_v59  ;;  %v1527_v35 = vmul.f32 %v2403_v45, %v1526_v33  ;;  %v1888_v31 = vperm.slane %v3147_v30, 3  ;;  %v1601_v58 = vsub.f32 1.0, %v1600_v16 }
 0x702   :  { %v2285_v7 = vpack.i.bf16 %v1874_v17, %v1867_v54  ;;  %v1610_v14 = vand.u32 2147483648, %v3112_v8  ;;  %v1691_v40 = vadd.f32 %v3120_v15, %v1598_v60  ;;  %2404 = vrcp.f32 %v3143_v28 }
 0x703   :  { %v1528_v0 = vmul.f32 0.5, %v1527_v35  ;;  %v2290_v49 = vpack.i.bf16 %v1888_v31, %v1881_v12  ;;  %v1602_v27 = vmul.f32 %v2401_v37, %v1601_v58  ;;  %v1895_v32 = vperm.slane %v3147_v30, 4 }
 0x704   :  { %2286 = vperm.xlu0 %2271, %v2285_v7   ;;  %v1902_v2 = vperm.slane %v3147_v30, 5  ;;  %2240 = vmatmul.msk.f32.gmra.mxu1 %vm124_vm1, %v1691_v40  ;;  %v1521_v36 = vsel %vm1520_vm12, %v3100_v59, %v1519_v34  ;;  %v1611_v56 = vor.u32 1.1754944e-38, %v1610_v14  ;;  %v1535_v59 = vand.u32 2147483648, %v3115_v29 }
 0x705   :  { %v1529_v39 = vsub.f32 1.5, %v1528_v0  ;;  %2291 = vperm.xlu1 %2272, %v2290_v49   ;;  %v1603_v43 = vadd.f32 %v2401_v37, %v1602_v27  ;;  %v1524_v44 = vsel %vm1522_vm5, %v1523_v41, %v1521_v36  ;;  %v1623_v19 = vand.u32 2147483647, %v3143_v28 }
 0x706   :  { %v1565_v57 = vadd.f32 1e-06, %v1524_v44  ;;  %v2295_v46 = vpack.i.bf16 %v1902_v2, %v1895_v32  ;;  %vm1619_vm12 = vweird.f32 %v3143_v28  ;;  %v1460_v54 = vmul.f32 %v3108_v21, %v3049_v50 }
 0x707   :  { %v1530_v42 = vmul.f32 %v2403_v45, %v1529_v39  ;;  %v1607_v47 = vsel %vm1606_vm7, %v2401_v37, %v1603_v43  ;;  %v1625_v45 = vand.u32 2147483648, %v3143_v28  ;;  %vm1624_vm14 = vcmp.eq.f32.partialorder %v1623_v19, 8.507059e+37 }
 0x708   :  { %v2405_v13 = vpop.eup %2404  ;;  %v1612_v62 = vsel %vm1609_vm8, %v1611_v56, %v1607_v47  ;;  %2406 = vrcp.f32 %v1565_v57  ;;  %v1640_v35 = vand.u32 2147483648, %v1565_v57  ;;  %v1638_v7 = vand.u32 2147483647, %v1565_v57 }
 0x709   :  { %v1531_v22 = vmul.f32 %v1530_v42, %v3115_v29  ;;  %v1613_v8 = vmul.f32 %v1612_v62, %v1459_v53  ;;  %v1615_v41 = vmul.f32 %v2405_v13, %v3143_v28  ;;  %vm1620_vm11 = vweird.f32 %v2405_v13 }
 0x70a   :  { %vm1621_vm13 = vmor %vm1619_vm12, %vm1620_vm11  ;;  %v1626_v23 = vor.u32 1.1754944e-38, %v1625_v45  ;;  %vm1634_vm2 = vweird.f32 %v1565_v57  ;;  %v1641_v0 = vor.u32 1.1754944e-38, %v1640_v35  ;;  %v1461_v50 = vmul.f32 %v3108_v21, %v3056_v48 }
 0x70b   :  { %v1533_v25 = vsel %vm1532_vm9, %v3115_v29, %v1531_v22  ;;  %v1692_v10 = vadd.f32 %v3120_v15, %v1613_v8  ;;  %v1616_v37 = vsub.f32 1.0, %v1615_v41  ;;  %vm1639_vm5 = vcmp.eq.f32.partialorder %v1638_v7, 8.507059e+37  ;;  %v38_v41 = vld [vmem:[%s3290_s4 + $0x4] sm:$0xff] }
 0x70c   :  { %2296 = vperm.xlu0 %2271, %v2295_v46   ;;  %v1536_v1 = vsel %vm1534_vm10, %v1535_v59, %v1533_v25  ;;  %v1462_v48 = vmul.f32 %v3108_v21, %v3063_v51  ;;  %1814 = vmatpush.msra.mxu2 %v38_v41 }
 0x70d   :  { %v1566_v61 = vadd.f32 1e-06, %v1536_v1  ;;  %2241 = vmatmul.msk.f32.gmra.mxu1 %vm124_vm1, %v1692_v10  ;;  %v1617_v16 = vmul.f32 %v2405_v13, %v1616_v37 }
 0x70e   :  { %v2407_v33 = vpop.eup %2406 }
 0x70f   :  { %2408 = vrcp.f32 %v1566_v61  ;;  %v1618_v9 = vadd.f32 %v2405_v13, %v1617_v16  ;;  %v1630_v29 = vmul.f32 %v2407_v33, %v1565_v57  ;;  %vm1635_vm15 = vweird.f32 %v2407_v33 }
 0x710   :  { %vm1636_vm3 = vmor %vm1634_vm2, %vm1635_vm15  ;;  %v1655_v32 = vand.u32 2147483648, %v1566_v61  ;;  %v1653_v36 = vand.u32 2147483647, %v1566_v61  ;;  %vm1649_vm7 = vweird.f32 %v1566_v61 }
 0x711   :  { %v1622_v17 = vsel %vm1621_vm13, %v2405_v13, %v1618_v9  ;;  %v1631_v12 = vsub.f32 1.0, %v1630_v29 }
 0x712   :  { %v1627_v34 = vsel %vm1624_vm14, %v1626_v23, %v1622_v17  ;;  %v1656_v42 = vor.u32 1.1754944e-38, %v1655_v32  ;;  %vm1654_vm9 = vcmp.eq.f32.partialorder %v1653_v36, 8.507059e+37  ;;  %v1463_v32 = vmul.f32 %v3108_v21, %v3076_v3 }
 0x713   :  { %v1628_v60 = vmul.f32 %v1627_v34, %v1460_v54  ;;  %v1632_v31 = vmul.f32 %v2407_v33, %v1631_v12 }
 0x715   :  { %v2409_v58 = vpop.eup %2408  ;;  %v1693_v55 = vadd.f32 %v3120_v15, %v1628_v60  ;;  %v1633_v14 = vadd.f32 %v2407_v33, %v1632_v31 }
 0x716   :  { %v1645_v28 = vmul.f32 %v2409_v58, %v1566_v61  ;;  %vm1650_vm6 = vweird.f32 %v2409_v58 }
 0x717   :  { %2242 = vmatmul.msk.f32.gmra.mxu1 %vm124_vm1, %v1693_v55  ;;  %v1637_v40 = vsel %vm1636_vm3, %v2407_v33, %v1633_v14  ;;  %vm1651_vm8 = vmor %vm1649_vm7, %vm1650_vm6 }
 0x718   :  { %v1646_v49 = vsub.f32 1.0, %v1645_v28  ;;  %v1642_v27 = vsel %vm1639_vm5, %v1641_v0, %v1637_v40 }
 0x719   :  { %v1643_v2 = vmul.f32 %v1642_v27, %v1461_v50  ;;  %v3199_v50 = vld [vmem:[%s3287_s5 + $0xa] ss:$0 sm:$0xff] }
 0x71a   :  { %v1647_v39 = vmul.f32 %v2409_v58, %v1646_v49 }
 0x71b   :  { %v1694_v43 = vadd.f32 %v3120_v15, %v1643_v2 }
 0x71c   :  { %v1648_v44 = vadd.f32 %v2409_v58, %v1647_v39 }
 0x71e   :  { %v1652_v56 = vsel %vm1651_vm8, %v2409_v58, %v1648_v44 }
 0x71f   :  { %v1657_v57 = vsel %vm1654_vm9, %v1656_v42, %v1652_v56  ;;  %2243 = vmatmul.msk.f32.gmra.mxu1 %vm124_vm1, %v1694_v43  ;;  %vm1997_vm9 = vcmask 1042434  }
 0x720   :  { %v1658_v53 = vmul.f32 %v1657_v57, %v1462_v48 }
 0x722   :  { %v1695_v47 = vadd.f32 %v3120_v15, %v1658_v53 }
 0x727   :  { %2244 = vmatmul.msk.f32.gmra.mxu1 %vm124_vm1, %v1695_v47 }
 0x750   :  { %v1444_v46 = vpop.xlane.xlu0 %1443 }
 0x751   :  { %v1454_v13 = vmul.f32 %v1444_v46, %v2602_v63 }
 0x753   :  { %2410 = vrsqrt.f32 %v1454_v13  ;;  %vm1544_vm10 = vcmp.eq.f32.partialorder %v1454_v13, inf  ;;  %v1547_v19 = vand.u32 2147483648, %v1454_v13  ;;  %vm1546_vm11 = vcmp.eq.f32.partialorder %v1454_v13, 0.0 }
 0x758   :  { %v1447_v22 = vpop.xlane.xlu1 %1446 }
 0x759   :  { %v2411_v62 = vpop.eup %2410  ;;  %v1455_v59 = vmul.f32 %v1447_v22, %v2602_v63  ;;  %v1464_v22 = vmul.f32 %v3108_v21, %v3088_v20 }
 0x75a   :  { %v1538_v8 = vmul.f32 %v2411_v62, %v1454_v13 }
 0x75b   :  { %2412 = vrsqrt.f32 %v1455_v59  ;;  %vm1556_vm12 = vcmp.eq.f32.partialorder %v1455_v59, inf  ;;  %v1559_v34 = vand.u32 2147483648, %v1455_v59  ;;  %vm1558_vm13 = vcmp.eq.f32.partialorder %v1455_v59, 0.0 }
 0x75c   :  { %v1539_v51 = vmul.f32 %v2411_v62, %v1538_v8 }
 0x75e   :  { %v1540_v25 = vmul.f32 0.5, %v1539_v51 }
 0x760   :  { %v1541_v10 = vsub.f32 1.5, %v1540_v25 }
 0x761   :  { %v2413_v37 = vpop.eup %2412 }
 0x762   :  { %v1542_v1 = vmul.f32 %v2411_v62, %v1541_v10  ;;  %v1550_v45 = vmul.f32 %v2413_v37, %v1455_v59 }
 0x764   :  { %v1543_v61 = vmul.f32 %v1542_v1, %v1454_v13  ;;  %v1551_v16 = vmul.f32 %v2413_v37, %v1550_v45 }
 0x766   :  { %v1552_v33 = vmul.f32 0.5, %v1551_v16  ;;  %v1545_v9 = vsel %vm1544_vm10, %v1454_v13, %v1543_v61  ;;  %vm1999_vm10 = vcmask 1043459  }
 0x767   :  { %v1548_v29 = vsel %vm1546_vm11, %v1547_v19, %v1545_v9  ;;  %vm2001_vm11 = vcmask 1044484  }
 0x768   :  { %v1553_v23 = vsub.f32 1.5, %v1552_v33  ;;  %v1567_v54 = vadd.f32 1e-06, %v1548_v29 }
 0x76a   :  { %v1554_v17 = vmul.f32 %v2413_v37, %v1553_v23  ;;  %2414 = vrcp.f32 %v1567_v54  ;;  %v1670_v14 = vand.u32 2147483648, %v1567_v54  ;;  %v1668_v0 = vand.u32 2147483647, %v1567_v54 }
 0x76b   :  { %vm1664_vm15 = vweird.f32 %v1567_v54  ;;  %v1909_v23 = vperm.slane %v3147_v30, 6 }
 0x76c   :  { %v1555_v12 = vmul.f32 %v1554_v17, %v1455_v59  ;;  %v1671_v27 = vor.u32 1.1754944e-38, %v1670_v14  ;;  %vm1669_vm3 = vcmp.eq.f32.partialorder %v1668_v0, 8.507059e+37 }
 0x76e   :  { %v1557_v35 = vsel %vm1556_vm12, %v1455_v59, %v1555_v12  ;;  %vm2003_vm12 = vcmask 1045509  }
 0x76f   :  { %v1560_v60 = vsel %vm1558_vm13, %v1559_v34, %v1557_v35  ;;  %vm2005_vm13 = vcmask 1046534  }
 0x770   :  { %v2415_v31 = vpop.eup %2414  ;;  %v1568_v7 = vadd.f32 1e-06, %v1560_v60 }
 0x771   :  { %v1660_v58 = vmul.f32 %v2415_v31, %v1567_v54  ;;  %vm1665_vm14 = vweird.f32 %v2415_v31  ;;  %v1916_v54 = vperm.slane %v3147_v30, 7 }
 0x772   :  { %2416 = vrcp.f32 %v1568_v7  ;;  %vm1666_vm2 = vmor %vm1664_vm15, %vm1665_vm14  ;;  %v1685_v57 = vand.u32 2147483648, %v1568_v7  ;;  %v1683_v46 = vand.u32 2147483647, %v1568_v7  ;;  %vm1679_vm6 = vweird.f32 %v1568_v7 }
 0x773   :  { %v1661_v55 = vsub.f32 1.0, %v1660_v58  ;;  %v2301_v17 = vpack.i.bf16 %v1916_v54, %v1909_v23  ;;  %vm2007_vm14 = vcmask 1047559  }
 0x774   :  { %v1686_v13 = vor.u32 1.1754944e-38, %v1685_v57  ;;  %vm1684_vm8 = vcmp.eq.f32.partialorder %v1683_v46, 8.507059e+37 }
 0x775   :  { %v1662_v28 = vmul.f32 %v2415_v31, %v1661_v55  ;;  %2302 = vperm.xlu2 %2300, %v2301_v17  }
 0x776   :  { %v2287_v30 = vpop.permute.xlu0 %2286 }
 0x777   :  { %v1663_v40 = vadd.f32 %v2415_v31, %v1662_v28 }
 0x778   :  { %v2417_v49 = vpop.eup %2416 }
 0x779   :  { %v1743_v2 = vpop.f32.mrf.mxu1  ;;  %v1667_v39 = vsel %vm1666_vm2, %v2415_v31, %v1663_v40  ;;  %v1675_v36 = vmul.f32 %v2417_v49, %v1568_v7  ;;  %vm1680_vm5 = vweird.f32 %v2417_v49 }
 0x77a   :  { %v1744_v43 = vadd.f32 %v3199_v50, %v1743_v2  ;;  %v1672_v44 = vsel %vm1669_vm3, %v1671_v27, %v1667_v39  ;;  %vm1681_vm7 = vmor %vm1679_vm6, %vm1680_vm5 }
 0x77b   :  { %v1673_v42 = vmul.f32 %v1672_v44, %v1463_v32  ;;  %v1676_v48 = vsub.f32 1.0, %v1675_v36  ;;  %v2292_v36 = vpop.permute.xlu1 %2291 }
 0x77c   :  { %v1767_v56 = vmax.f32 %v1744_v43, 0.0  ;;  %v2293_v57 = vunpack.i.l.bf16 %v2292_v36 }
 0x77d   :  { %v1696_v53 = vadd.f32 %v3120_v15, %v1673_v42  ;;  %v1677_v47 = vmul.f32 %v2417_v49, %v1676_v48  ;;  %v2289_v48 = vunpack.i.h.bf16 %v2287_v30 }
 0x77e   :  { %2247 = vmatmul.msk.f32.vlgmr.msra.gmra.mxu2 %vm881_vm4, %v1767_v56 }
 0x77f   :  { %2245 = vmatmul.msk.f32.gmra.mxu1 %vm124_vm1, %v1696_v53  ;;  %v1678_v3 = vadd.f32 %v2417_v49, %v1677_v47  ;;  %v2294_v47 = vunpack.i.h.bf16 %v2292_v36 }
 0x781   :  { %v1682_v62 = vsel %vm1681_vm7, %v2417_v49, %v1678_v3  ;;  %v1746_v59 = vpop.f32.mrf.mxu1 }
 0x782   :  { %v1687_v8 = vsel %vm1684_vm8, %v1686_v13, %v1682_v62  ;;  %v1747_v51 = vadd.f32 %v3199_v50, %v1746_v59 }
 0x783   :  { %v1688_v41 = vmul.f32 %v1687_v8, %v1464_v22 }
 0x784   :  { %v1768_v25 = vmax.f32 %v1747_v51, 0.0 }
 0x785   :  { %v1697_v10 = vadd.f32 %v3120_v15, %v1688_v41 }
 0x786   :  { %2248 = vmatmul.msk.f32.gmra.mxu2 %vm881_vm4, %v1768_v25 }
 0x787   :  { %2246 = vmatmul.msk.f32.gmra.mxu1 %vm124_vm1, %v1697_v10 }
 0x78a   :  { %v1749_v37 = vpop.f32.mrf.mxu1 }
 0x78b   :  { %v1750_v1 = vadd.f32 %v3199_v50, %v1749_v37 }
 0x78d   :  { %v1769_v45 = vmax.f32 %v1750_v1, 0.0 }
 0x78f   :  { %2249 = vmatmul.msk.f32.gmra.mxu2 %vm881_vm4, %v1769_v45 }
 0x794   :  { %v1752_v20 = vpop.f32.mrf.mxu1 }
 0x795   :  { %v1753_v21 = vadd.f32 %v3199_v50, %v1752_v20 }
 0x797   :  { %v1770_v61 = vmax.f32 %v1753_v21, 0.0 }
 0x799   :  { %2250 = vmatmul.msk.f32.gmra.mxu2 %vm881_vm4, %v1770_v61 }
 0x79c   :  { %v1755_v16 = vpop.f32.mrf.mxu1 }
 0x79d   :  { %v1756_v19 = vadd.f32 %v3199_v50, %v1755_v16 }
 0x79f   :  { %v1771_v15 = vmax.f32 %v1756_v19, 0.0 }
 0x7a1   :  { %2251 = vmatmul.msk.f32.gmra.mxu2 %vm881_vm4, %v1771_v15 }
 0x7a4   :  { %v1758_v33 = vpop.f32.mrf.mxu1 }
 0x7a5   :  { %v1759_v9 = vadd.f32 %v3199_v50, %v1758_v33 }
 0x7a7   :  { %v1772_v29 = vmax.f32 %v1759_v9, 0.0 }
 0x7a9   :  { %2252 = vmatmul.msk.f32.gmra.mxu2 %vm881_vm4, %v1772_v29 }
 0x7cf   :  { %v2303_v61 = vpop.permute.xlu2 %2302 }
 0x7d0   :  { %v2304_v23 = vunpack.i.l.bf16 %v2303_v61 }
 0x7fc   :  { %v1761_v12 = vpop.f32.mrf.mxu1 }
 0x7fd   :  { %v1762_v34 = vadd.f32 %v3199_v50, %v1761_v12 }
 0x7ff   :  { %v1773_v35 = vmax.f32 %v1762_v34, 0.0 }
 0x801   :  { %2253 = vmatmul.msk.f32.gmra.mxu2 %vm881_vm4, %v1773_v35  ;;  %v1816_v58 = vpop.f32.mrf.mxu2 }
 0x802   :  { %v1840_v32 = vadd.f32 %v1816_v58, %v2987_v52  ;;  %v2288_v52 = vunpack.i.l.bf16 %v2287_v30 }
 0x804   :  { %v1764_v60 = vpop.f32.mrf.mxu1 }
 0x805   :  { %v1765_v31 = vadd.f32 %v3199_v50, %v1764_v60  ;;  %v2315_v50 = vld [vmem:[%s3287_s5 + $0xb] ss:$0 sm:$0xff] }
 0x806   :  { %v1849_v56 = vadd.f32 %v2315_v50, %v1840_v32 }
 0x807   :  { %v1774_v7 = vmax.f32 %v1765_v31, 0.0 }
 0x808   :  { %v1923_v62 = vmul.f32 %v2288_v52, %v1849_v56 }
 0x809   :  { %2254 = vmatmul.msk.f32.gmra.mxu2 %vm881_vm4, %v1774_v7  ;;  %v1819_v55 = vpop.f32.mrf.mxu2  ;;  %vm1995_vm4 = vcmask 1041409  }
 0x80a   :  { %v1841_v40 = vadd.f32 %v1819_v55, %v2992_v4  ;;  %v2297_v4 = vpop.permute.xlu0 %2296  ;;  %v1931_v41 = vsel %vm124_vm1, %v1923_v62, 0.0 }
 0x80b   :  { %v2298_v13 = vunpack.i.l.bf16 %v2297_v4  ;;  %v1932_v20 = vrot.slane %v1931_v41, 4 }
 0x80c   :  { %v1850_v43 = vadd.f32 %v2315_v50, %v1841_v40 }
 0x80d   :  { %v1933_v17 = vadd.f32 %v1932_v20, %v1931_v41 }
 0x80e   :  { %v1924_v46 = vmul.f32 %v2289_v48, %v1850_v43 }
 0x80f   :  { %v1934_v55 = vrot.slane %v1933_v17, 2 }
 0x810   :  { %v1938_v8 = vsel %vm124_vm1, %v1924_v46, 0.0 }
 0x811   :  { %v1939_v10 = vrot.slane %v1938_v8, 4  ;;  %v1935_v36 = vadd.f32 %v1934_v55, %v1933_v17 }
 0x812   :  { %v1822_v14 = vpop.f32.mrf.mxu2 }
 0x813   :  { %v1842_v49 = vadd.f32 %v1822_v14, %v2997_v18  ;;  %v1940_v33 = vadd.f32 %v1939_v10, %v1938_v8  ;;  %v1936_v52 = vrot.slane %v1935_v36, 1 }
 0x815   :  { %v1851_v42 = vadd.f32 %v2315_v50, %v1842_v49  ;;  %v1941_v60 = vrot.slane %v1940_v33, 2  ;;  %v1937_v62 = vadd.f32 %v1936_v52, %v1935_v36 }
 0x817   :  { %v1925_v22 = vmul.f32 %v2293_v57, %v1851_v42  ;;  %v1942_v40 = vadd.f32 %v1941_v60, %v1940_v33 }
 0x819   :  { %v1945_v51 = vsel %vm124_vm1, %v1925_v22, 0.0 }
 0x81a   :  { %v1946_v1 = vrot.slane %v1945_v51, 4 }
 0x81c   :  { %v1825_v28 = vpop.f32.mrf.mxu2  ;;  %v1947_v29 = vadd.f32 %v1946_v1, %v1945_v51 }
 0x81d   :  { %v1843_v2 = vadd.f32 %v1825_v28, %v3002_v11  ;;  %v2299_v11 = vunpack.i.h.bf16 %v2297_v4  ;;  %v1943_v4 = vrot.slane %v1942_v40, 1 }
 0x81e   :  { %v1948_v7 = vrot.slane %v1947_v29, 2 }
 0x81f   :  { %v1852_v18 = vadd.f32 %v2315_v50, %v1843_v2  ;;  %v2305_v2 = vunpack.i.h.bf16 %v2303_v61 }
 0x820   :  { %v1949_v32 = vadd.f32 %v1948_v7, %v1947_v29 }
 0x824   :  { %v1828_v0 = vpop.f32.mrf.mxu2 }
 0x825   :  { %v1844_v39 = vadd.f32 %v1828_v0, %v3007_v24  ;;  %v1926_v24 = vmul.f32 %v2294_v47, %v1852_v18  ;;  %v1950_v18 = vrot.slane %v1949_v32, 1 }
 0x827   :  { %v1853_v53 = vadd.f32 %v2315_v50, %v1844_v39  ;;  %v1952_v25 = vsel %vm124_vm1, %v1926_v24, 0.0 }
 0x828   :  { %v1953_v21 = vrot.slane %v1952_v25, 4 }
 0x829   :  { %v1927_v59 = vmul.f32 %v2298_v13, %v1853_v53 }
 0x82a   :  { %v1954_v12 = vadd.f32 %v1953_v21, %v1952_v25 }
 0x82b   :  { %v1959_v37 = vsel %vm124_vm1, %v1927_v59, 0.0 }
 0x82c   :  { %v1831_v27 = vpop.f32.mrf.mxu2  ;;  %v1960_v19 = vrot.slane %v1959_v37, 4  ;;  %v1955_v14 = vrot.slane %v1954_v12, 2 }
 0x82d   :  { %v1845_v44 = vadd.f32 %v1831_v27, %v3012_v38 }
 0x82e   :  { %v1961_v34 = vadd.f32 %v1960_v19, %v1959_v37  ;;  %v1956_v43 = vadd.f32 %v1955_v14, %v1954_v12 }
 0x82f   :  { %v1854_v3 = vadd.f32 %v2315_v50, %v1845_v44 }
 0x830   :  { %v1962_v30 = vrot.slane %v1961_v34, 2  ;;  %v1957_v47 = vrot.slane %v1956_v43, 1 }
 0x831   :  { %v1928_v38 = vmul.f32 %v2299_v11, %v1854_v3  ;;  %v1944_v3 = vadd.f32 %v1943_v4, %v1942_v40  ;;  %v1951_v11 = vadd.f32 %v1950_v18, %v1949_v32 }
 0x832   :  { %v1963_v42 = vadd.f32 %v1962_v30, %v1961_v34  ;;  %v1958_v24 = vadd.f32 %v1957_v47, %v1956_v43 }
 0x833   :  { %v1966_v45 = vsel %vm124_vm1, %v1928_v38, 0.0  ;;  %v1996_v41 = vsel %vm1995_vm4, %v1944_v3, %v1937_v62 }
 0x834   :  { %v1967_v9 = vrot.slane %v1966_v45, 4  ;;  %v1964_v46 = vrot.slane %v1963_v42, 1  ;;  %v1998_v10 = vsel %vm1997_vm9, %v1951_v11, %v1996_v41 }
 0x835   :  { %v2000_v1 = vsel %vm1999_vm10, %v1958_v24, %v1998_v10  ;;  %v39_v10 = vld [vmem:[%s3290_s4 + $0xc] sm:$0xf] }
 0x836   :  { %v1968_v31 = vadd.f32 %v1967_v9, %v1966_v45  ;;  %v1965_v8 = vadd.f32 %v1964_v46, %v1963_v42  ;;  %2257 = vmatpush.msk.msra.mxu3 %vm149_vm0, %v39_v10 }
 0x838   :  { %v1969_v49 = vrot.slane %v1968_v31, 2  ;;  %v2002_v45 = vsel %vm2001_vm11, %v1965_v8, %v2000_v1 }
 0x83a   :  { %v1970_v56 = vadd.f32 %v1969_v49, %v1968_v31 }
 0x83c   :  { %v1971_v13 = vrot.slane %v1970_v56, 1 }
 0x83e   :  { %v1972_v38 = vadd.f32 %v1971_v13, %v1970_v56 }
 0x840   :  { %v2004_v21 = vsel %vm2003_vm12, %v1972_v38, %v2002_v45 }
 0x884   :  { %v1834_v16 = vpop.f32.mrf.mxu2 }
 0x885   :  { %v1846_v15 = vadd.f32 %v1834_v16, %v3025_v26 }
 0x887   :  { %v1855_v54 = vadd.f32 %v2315_v50, %v1846_v15 }
 0x889   :  { %v1929_v35 = vmul.f32 %v2304_v23, %v1855_v54 }
 0x88b   :  { %v1973_v58 = vsel %vm124_vm1, %v1929_v35, 0.0 }
 0x88c   :  { %v1974_v28 = vrot.slane %v1973_v58, 4  ;;  %v1837_v0 = vpop.f32.mrf.mxu2 }
 0x88d   :  { %v1847_v26 = vadd.f32 %v1837_v0, %v3037_v5 }
 0x88e   :  { %v1975_v27 = vadd.f32 %v1974_v28, %v1973_v58 }
 0x88f   :  { %v1856_v39 = vadd.f32 %v2315_v50, %v1847_v26 }
 0x890   :  { %v1976_v44 = vrot.slane %v1975_v27, 2 }
 0x891   :  { %v1930_v48 = vmul.f32 %v2305_v2, %v1856_v39 }
 0x892   :  { %v1977_v57 = vadd.f32 %v1976_v44, %v1975_v27 }
 0x893   :  { %v1980_v53 = vsel %vm124_vm1, %v1930_v48, 0.0 }
 0x894   :  { %v1981_v5 = vrot.slane %v1980_v53, 4  ;;  %v1978_v50 = vrot.slane %v1977_v57, 1 }
 0x896   :  { %v1982_v22 = vadd.f32 %v1981_v5, %v1980_v53  ;;  %v1979_v25 = vadd.f32 %v1978_v50, %v1977_v57 }
 0x898   :  { %v1983_v59 = vrot.slane %v1982_v22, 2  ;;  %v2006_v61 = vsel %vm2005_vm13, %v1979_v25, %v2004_v21 }
 0x89a   :  { %v1984_v51 = vadd.f32 %v1983_v59, %v1982_v22 }
 0x89c   :  { %v1985_v37 = vrot.slane %v1984_v51, 1 }
 0x89e   :  { %v1986_v20 = vadd.f32 %v1985_v37, %v1984_v51 }
 0x8a0   :  { %v2008_v16 = vsel %vm2007_vm14, %v1986_v20, %v2006_v61 }
 0x8a1   :  { %v2010_v19 = vsel %vm124_vm1, %v2008_v16, 0.0 }
 0x8a2   :  { %2011 = vadd.xlane.f32.xlu1 %v2010_v19 }
 0x915   :  { %v2012_v15 = vpop.xlane.xlu1 %2011 }
 0x916   :  { %v2013_v33 = vmul.f32 %v2012_v15, %v2544_v6 }
 0x918   :  { %v2015_v9 = vrot.slane %v2013_v33, 1  ;;  %v2016_v29 = vrot.slane %v2013_v33, 2  ;;  %v2017_v23 = vrot.slane %v2013_v33, 3  ;;  %v2018_v54 = vrot.slane %v2013_v33, 4 }
 0x919   :  { %v2019_v17 = vrot.slane %v2013_v33, 5  ;;  %v2020_v12 = vrot.slane %v2013_v33, 6  ;;  %v2021_v34 = vrot.slane %v2013_v33, 7  ;;  %v2030_v35 = vsub.f32 %v1937_v62, %v2013_v33 }
 0x91a   :  { %v2031_v60 = vsub.f32 %v1944_v3, %v2015_v9  ;;  %v2032_v31 = vsub.f32 %v1951_v11, %v2016_v29  ;;  %v2033_v7 = vsub.f32 %v1958_v24, %v2017_v23  ;;  %v2034_v58 = vsub.f32 %v1965_v8, %v2018_v54 }
 0x91b   :  { %v2035_v55 = vsub.f32 %v1972_v38, %v2019_v17  ;;  %v2036_v14 = vsub.f32 %v1979_v25, %v2020_v12  ;;  %v2037_v28 = vsub.f32 %v1986_v20, %v2021_v34  ;;  %v2038_v49 = vmul.f32 %v2030_v35, %v2030_v35 }
 0x91c   :  { %v2039_v0 = vmul.f32 %v2031_v60, %v2031_v60  ;;  %v2040_v30 = vmul.f32 %v2032_v31, %v2032_v31  ;;  %v2041_v26 = vmul.f32 %v2033_v7, %v2033_v7  ;;  %v2042_v40 = vmul.f32 %v2034_v58, %v2034_v58 }
 0x91d   :  { %v2082_v6 = vrot.slane %v2031_v60, 7  ;;  %v2043_v27 = vmul.f32 %v2035_v55, %v2035_v55  ;;  %v2044_v39 = vmul.f32 %v2036_v14, %v2036_v14  ;;  %v2045_v43 = vmul.f32 %v2037_v28, %v2037_v28 }
 0x91e   :  { %v2054_v32 = vrot.slane %v2039_v0, 7  ;;  %v2056_v2 = vrot.slane %v2040_v30, 6  ;;  %v2058_v42 = vrot.slane %v2041_v26, 5  ;;  %v2084_v48 = vrot.slane %v2032_v31, 6 }
 0x91f   :  { %v2083_v36 = vsel %vm1995_vm4, %v2082_v6, %v2030_v35  ;;  %v2060_v56 = vrot.slane %v2042_v40, 4  ;;  %v2086_v18 = vrot.slane %v2033_v7, 5  ;;  %v2062_v53 = vrot.slane %v2043_v27, 3 }
 0x920   :  { %v2055_v44 = vsel %vm1995_vm4, %v2054_v32, %v2038_v49  ;;  %v2085_v52 = vsel %vm1997_vm9, %v2084_v48, %v2083_v36  ;;  %v2088_v47 = vrot.slane %v2034_v58, 4  ;;  %v2064_v46 = vrot.slane %v2044_v39, 2 }
 0x921   :  { %v2057_v4 = vsel %vm1997_vm9, %v2056_v2, %v2055_v44  ;;  %v2087_v3 = vsel %vm1999_vm10, %v2086_v18, %v2085_v52  ;;  %v2090_v13 = vrot.slane %v2035_v55, 3  ;;  %v2066_v11 = vrot.slane %v2045_v43, 1 }
 0x922   :  { %v2059_v57 = vsel %vm1999_vm10, %v2058_v42, %v2057_v4  ;;  %v2089_v50 = vsel %vm2001_vm11, %v2088_v47, %v2087_v3  ;;  %v2092_v62 = vrot.slane %v2036_v14, 2  ;;  %v2094_v8 = vrot.slane %v2037_v28, 1  ;;  %v2317_v14 = vld [vmem:[%s3287_s5 + $0x9] ss:$0 sm:$0xff] }
 0x923   :  { %v2061_v5 = vsel %vm2001_vm11, %v2060_v56, %v2059_v57  ;;  %v2091_v59 = vsel %vm2003_vm12, %v2090_v13, %v2089_v50  ;;  %vm2173_vm9 = vcmask 7168  }
 0x924   :  { %v2063_v22 = vsel %vm2003_vm12, %v2062_v53, %v2061_v5  ;;  %v2093_v51 = vsel %vm2005_vm13, %v2092_v62, %v2091_v59 }
 0x925   :  { %v2065_v24 = vsel %vm2005_vm13, %v2064_v46, %v2063_v22  ;;  %v2095_v25 = vsel %vm2007_vm14, %v2094_v8, %v2093_v51 }
 0x926   :  { %v2067_v38 = vsel %vm2007_vm14, %v2066_v11, %v2065_v24 }
 0x927   :  { %v2069_v41 = vsel %vm124_vm1, %v2067_v38, 0.0 }
 0x928   :  { %2070 = vadd.xlane.f32.xlu0 %v2069_v41 }
 0x99b   :  { %v2071_v37 = vpop.xlane.xlu0 %2070 }
 0x99c   :  { %v2072_v1 = vmul.f32 %v2071_v37, %v2602_v63  ;;  %v2316_v63 = vld [vmem:[%s3287_s5 + $0x8] ss:$0 sm:$0xff] }
 0x99d   :  { %v2097_v58 = vmul.f32 %v2316_v63, %v2095_v25 }
 0x99e   :  { %2418 = vrsqrt.f32 %v2072_v1  ;;  %vm2105_vm15 = vcmp.eq.f32.partialorder %v2072_v1, inf  ;;  %v2108_v33 = vand.u32 2147483648, %v2072_v1  ;;  %vm2107_vm2 = vcmp.eq.f32.partialorder %v2072_v1, 0.0 }
 0x9a4   :  { %v2419_v45 = vpop.eup %2418 }
 0x9a5   :  { %v2099_v20 = vmul.f32 %v2419_v45, %v2072_v1 }
 0x9a7   :  { %v2100_v21 = vmul.f32 %v2419_v45, %v2099_v20 }
 0x9a9   :  { %v2101_v61 = vmul.f32 0.5, %v2100_v21 }
 0x9ab   :  { %v2102_v16 = vsub.f32 1.5, %v2101_v61 }
 0x9ad   :  { %v2103_v19 = vmul.f32 %v2419_v45, %v2102_v16 }
 0x9af   :  { %v2104_v15 = vmul.f32 %v2103_v19, %v2072_v1 }
 0x9b1   :  { %v2106_v9 = vsel %vm2105_vm15, %v2072_v1, %v2104_v15 }
 0x9b2   :  { %v2109_v29 = vsel %vm2107_vm2, %v2108_v33, %v2106_v9 }
 0x9b3   :  { %v2110_v23 = vadd.f32 1e-06, %v2109_v29 }
 0x9b5   :  { %2420 = vrcp.f32 %v2110_v23  ;;  %v2122_v34 = vand.u32 2147483648, %v2110_v23  ;;  %v2120_v60 = vand.u32 2147483647, %v2110_v23  ;;  %vm2116_vm3 = vweird.f32 %v2110_v23 }
 0x9b7   :  { %v2123_v7 = vor.u32 1.1754944e-38, %v2122_v34  ;;  %vm2121_vm6 = vcmp.eq.f32.partialorder %v2120_v60, 8.507059e+37 }
 0x9bb   :  { %v2421_v54 = vpop.eup %2420 }
 0x9bc   :  { %v2112_v17 = vmul.f32 %v2421_v54, %v2110_v23  ;;  %vm2117_vm0 = vweird.f32 %v2421_v54 }
 0x9bd   :  { %vm2118_vm5 = vmor %vm2116_vm3, %vm2117_vm0 }
 0x9be   :  { %v2113_v12 = vsub.f32 1.0, %v2112_v17 }
 0x9c0   :  { %v2114_v35 = vmul.f32 %v2421_v54, %v2113_v12 }
 0x9c2   :  { %v2115_v31 = vadd.f32 %v2421_v54, %v2114_v35 }
 0x9c4   :  { %v2119_v55 = vsel %vm2118_vm5, %v2421_v54, %v2115_v31 }
 0x9c5   :  { %v2124_v28 = vsel %vm2121_vm6, %v2123_v7, %v2119_v55 }
 0x9c6   :  { %v2125_v0 = vmul.f32 %v2124_v28, %v2097_v58 }
 0x9c8   :  { %v2127_v30 = vadd.f32 %v2317_v14, %v2125_v0 }
 0x9ca   :  { %2258 = vmatmul.msk.f32.vlgmr.msra.gmra.mxu3 %vm124_vm1, %v2127_v30 }
 0xa4d   :  { %v2151_v26 = vpop.f32.mrf.mxu3 }
 0xa4e   :  { %v2259_v40 = vmul.f32 -1.442695, %v2151_v26 }
 0xa50   :  { %2422 = vpow2.f32 %v2259_v40 }
 0xa56   :  { %v2423_v6 = vpop.eup %2422 }
 0xa57   :  { %v2157_v49 = vadd.f32 1.0, %v2423_v6 }
 0xa59   :  { %2424 = vrcp.f32 %v2157_v49  ;;  %v2169_v39 = vand.u32 2147483648, %v2157_v49  ;;  %v2167_v43 = vand.u32 2147483647, %v2157_v49  ;;  %vm2163_vm8 = vweird.f32 %v2157_v49 }
 0xa5b   :  { %v2170_v42 = vor.u32 1.1754944e-38, %v2169_v39  ;;  %vm2168_vm1 = vcmp.eq.f32.partialorder %v2167_v43, 8.507059e+37 }
 0xa5f   :  { %v2425_v27 = vpop.eup %2424 }
 0xa60   :  { %v2159_v32 = vmul.f32 %v2425_v27, %v2157_v49  ;;  %vm2164_vm7 = vweird.f32 %v2425_v27 }
 0xa61   :  { %vm2165_vm4 = vmor %vm2163_vm8, %vm2164_vm7 }
 0xa62   :  { %v2160_v2 = vsub.f32 1.0, %v2159_v32 }
 0xa64   :  { %v2161_v36 = vmul.f32 %v2425_v27, %v2160_v2 }
 0xa66   :  { %v2162_v44 = vadd.f32 %v2425_v27, %v2161_v36 }
 0xa68   :  { %v2166_v48 = vsel %vm2165_vm4, %v2425_v27, %v2162_v44 }
 0xa69   :  { %v2171_v4 = vsel %vm2168_vm1, %v2170_v42, %v2166_v48 }
 0xa6a   :  { %2174 = vst.msk [vmem:[%s3291_s6] sm:$0xff] %vm2173_vm9, %v2171_v4 }

</bundles_post_ra>
